<compile_context>
chip_gen: v5e
topology: v5e:2x2
jax: 0.10.0
libtpu: 0.0.40
codegen_flags: <defaults>
</compile_context>

<pallas_src>
import functools
import math

import jax
import jax.numpy as jnp
from jax.experimental import pallas as pl
from jax.experimental.pallas import tpu as pltpu


def _erf_poly(x):
    # Abramowitz & Stegun 7.1.26 polynomial erf (max abs err ~1.5e-7). Uses VPU ops,
    # one EUP exp and one EUP approx-reciprocal, so it lowers cleanly in Mosaic
    # regardless of whether lax.erf has a lowering on the current toolchain.
    p = 0.3275911
    a1, a2, a3, a4, a5 = 0.254829592, -0.284496736, 1.421413741, -1.453152027, 1.061405429
    sign = jnp.where(x >= 0.0, 1.0, -1.0)
    z = jnp.abs(x)
    t = pl.reciprocal(1.0 + p * z, approx=True)       # EUP rcp, off the VALU
    poly = ((((a5 * t + a4) * t + a3) * t + a2) * t + a1) * t
    return sign * (1.0 - poly * jnp.exp(-z * z))


def _gelu_exact(x):
    # Matches torch.nn.GELU() default (erf formulation).
    return 0.5 * x * (1.0 + _erf_poly(x * (1.0 / math.sqrt(2.0))))


def _res_block_kernel(x_ref, w1_ref, b1_ref, ln_g_ref, ln_b_ref,
                      w2_ref, b2_ref, grn_g_ref, grn_b_ref,
                      w3_ref, b3_ref, *rest, batch, seq_len):
    # x_ref:             (B*L, Cin)  flattened channels-last input, f32
    # w*_ref:            pre-transposed weights, shape (in, out), bf16 (MXU operands)
    # b*/ln_*/grn_*_ref: (1, C) f32
    # rest:              (o_ref,)  or  (wp_ref, bp_ref, o_ref) when in != out features
    has_proj = len(rest) == 3
    if has_proj:
        wp_ref, bp_ref, o_ref = rest
    else:
        (o_ref,) = rest

    bf16 = jnp.bfloat16
    x = x_ref[...]                                    # f32 (exact identity residual)
    x_b = x.astype(bf16)                              # bf16 MXU operand

    # linear_1 (pointwise conv == per-position channel-mixing matmul), f32 accumulate
    h = jnp.dot(x_b, w1_ref[...], preferred_element_type=jnp.float32) + b1_ref[...]

    # LayerNorm(mid_features), eps = 1e-5 (PyTorch default), biased variance, f32 stats
    mu = jnp.mean(h, axis=-1, keepdims=True)
    var = jnp.mean(jnp.square(h - mu), axis=-1, keepdims=True)
    h = (h - mu) * jax.lax.rsqrt(var + 1e-5)
    h = h * ln_g_ref[...] + ln_b_ref[...]

    # linear_2
    h = jnp.dot(h.astype(bf16), w2_ref[...], preferred_element_type=jnp.float32) + b2_ref[...]

    # GELU (exact/erf variant, matching nn.GELU() default), f32
    h = _gelu_exact(h)

    # GRN (vectorized): per batch element, L2 norm over the sequence axis (dim=1 of
    # (B, L, C)), normalized by the channel-mean of those norms. The (B*L, C)->(B, L, C)
    # reshape is free (L is a multiple of 8, lane dim unchanged); the sum over L is a
    # sublane/XLU reduce; no per-batch slices or concatenates are materialized.
    mid = h.shape[-1]
    h3 = h.reshape(batch, seq_len, mid)
    gx = jnp.sqrt(jnp.sum(h3 * h3, axis=1, keepdims=True))                 # (B, 1, mid)
    inv = pl.reciprocal(jnp.mean(gx, axis=-1, keepdims=True) + 1e-6,       # (B, 1, 1)
                        approx=True)
    nx = gx * inv                                                          # (B, 1, mid)
    gamma = grn_g_ref[...].reshape(1, 1, mid)
    beta = grn_b_ref[...].reshape(1, 1, mid)
    h3 = gamma * (h3 * nx) + beta + h3
    h = h3.reshape(batch * seq_len, mid)

    # linear_3
    h = jnp.dot(h.astype(bf16), w3_ref[...], preferred_element_type=jnp.float32) + b3_ref[...]

    # residual: identity (exact f32 x), or Linear projection when in != out features
    if has_proj:
        res = jnp.dot(x_b, wp_ref[...], preferred_element_type=jnp.float32) + bp_ref[...]
    else:
        res = x

    o_ref[...] = (res + h).astype(o_ref.dtype)


def prepare_kernel_params(p):
    """One-time parameter prep (call at model init, NOT per step).

    Transposes PyTorch-convention (out, in) weights to (in, out) and casts them to bf16
    (MXU operands; halves the dominant weight DMA bytes). Biases / LN / GRN params stay
    f32 as (1, C) rows so all statistics and adds happen in f32. The per-call wrapper
    does no array munging.
    """
    f32, bf16 = jnp.float32, jnp.bfloat16
    kp = {
        "w1_t": p["w1"].T.astype(bf16),
        "b1": p["b1"].reshape(1, -1).astype(f32),
        "ln_g": p["ln_g"].reshape(1, -1).astype(f32),
        "ln_b": p["ln_b"].reshape(1, -1).astype(f32),
        "w2_t": p["w2"].T.astype(bf16),
        "b2": p["b2"].reshape(1, -1).astype(f32),
        "grn_g": p["grn_g"].reshape(1, -1).astype(f32),
        "grn_b": p["grn_b"].reshape(1, -1).astype(f32),
        "w3_t": p["w3"].T.astype(bf16),
        "b3": p["b3"].reshape(1, -1).astype(f32),
    }
    if "wp" in p:
        kp["wp_t"] = p["wp"].T.astype(bf16)
        kp["bp"] = p["bp"].reshape(1, -1).astype(f32)
    return kp


@jax.jit
def res_block_conv1d(x, kp):
    """Fused ResBlockConv1d forward. x: (B, L, in_features) channels-last, f32."""
    B, L, Cin = x.shape
    Cout = kp["w3_t"].shape[1]
    has_proj = "wp_t" in kp

    x2d = x.reshape(B * L, Cin)     # no dtype/layout munging in the hot path
    args = [x2d, kp["w1_t"], kp["b1"], kp["ln_g"], kp["ln_b"],
            kp["w2_t"], kp["b2"], kp["grn_g"], kp["grn_b"],
            kp["w3_t"], kp["b3"]]
    if has_proj:
        args += [kp["wp_t"], kp["bp"]]

    vmem = pl.BlockSpec(memory_space=pltpu.MemorySpace.VMEM)
    out2d = pl.pallas_call(
        functools.partial(_res_block_kernel, batch=B, seq_len=L),
        out_shape=jax.ShapeDtypeStruct((B * L, Cout), jnp.float32),
        in_specs=[vmem] * len(args),
        out_specs=vmem,
    )(*args)
    return out2d.reshape(B, L, Cout)


# ----------------------------- pure-JAX references ------------------------------------

def res_block_conv1d_ref_f32(x, p):
    """Full-f32 reference mirroring the intended PyTorch forward."""
    h = x @ p["w1"].T + p["b1"]
    mu = h.mean(-1, keepdims=True)
    var = ((h - mu) ** 2).mean(-1, keepdims=True)
    h = (h - mu) / jnp.sqrt(var + 1e-5) * p["ln_g"] + p["ln_b"]
    h = h @ p["w2"].T + p["b2"]
    h = jax.nn.gelu(h, approximate=False)                 # exact erf GELU (PyTorch default)
    gx = jnp.sqrt(jnp.sum(h * h, axis=1, keepdims=True))  # torch.norm(h, p=2, dim=1)
    nx = gx / (jnp.mean(gx, axis=-1, keepdims=True) + 1e-6)
    h = p["grn_g"] * (h * nx) + p["grn_b"] + h
    h = h @ p["w3"].T + p["b3"]
    res = (x @ p["wp"].T + p["bp"]) if "wp" in p else x
    return res + h


def res_block_conv1d_ref_bf16(x, p):
    """Reference with the kernel's numerics (bf16 matmul operands, f32 accumulation,
    f32 statistics). Isolates kernel bugs from bf16 quantization noise."""
    bf16, f32 = jnp.bfloat16, jnp.float32
    kp = prepare_kernel_params(p)

    def dot(a, w_t_bf16, b):
        return jnp.dot(a.astype(bf16), w_t_bf16, preferred_element_type=f32) + b

    B, L, Cin = x.shape
    x2d = x.reshape(B * L, Cin)
    h = dot(x2d, kp["w1_t"], kp["b1"])
    mu = h.mean(-1, keepdims=True)
    var = ((h - mu) ** 2).mean(-1, keepdims=True)
    h = (h - mu) / jnp.sqrt(var + 1e-5) * kp["ln_g"] + kp["ln_b"]
    h = dot(h, kp["w2_t"], kp["b2"])
    h = jax.nn.gelu(h, approximate=False)
    h3 = h.reshape(B, L, -1)
    gx = jnp.sqrt(jnp.sum(h3 * h3, axis=1, keepdims=True))
    nx = gx / (jnp.mean(gx, axis=-1, keepdims=True) + 1e-6)
    h3 = kp["grn_g"] * (h3 * nx) + kp["grn_b"] + h3
    h = h3.reshape(B * L, -1)
    h = dot(h, kp["w3_t"], kp["b3"])
    res = dot(x2d, kp["wp_t"], kp["bp"]) if "wp_t" in kp else x2d
    return (res + h).reshape(B, L, -1)


if __name__ == "__main__":
    B, L = 2, 16                        # B*L = 32 rows: sublane-aligned (multiple of 8)
    in_f, mid_f, out_f = 128, 256, 128  # lane-aligned channel dims

    key = jax.random.PRNGKey(0)
    keys = jax.random.split(key, 16)

    def uinit(k, shape, fan_in):
        bound = 1.0 / math.sqrt(fan_in)
        return jax.random.uniform(k, shape, jnp.float32, minval=-bound, maxval=bound)

    # PyTorch-convention parameters (weights stored as (out, in)).
    # GRN gamma/beta are zero-initialized in the PyTorch module (making GRN an identity);
    # random values are used here so the GRN math is actually exercised by the check.
    raw = {
        "w1": uinit(keys[0], (mid_f, in_f), in_f),
        "b1": uinit(keys[1], (mid_f,), in_f),
        "ln_g": 1.0 + 0.1 * jax.random.normal(keys[2], (mid_f,), jnp.float32),
        "ln_b": 0.1 * jax.random.normal(keys[3], (mid_f,), jnp.float32),
        "w2": uinit(keys[4], (mid_f, mid_f), mid_f),
        "b2": uinit(keys[5], (mid_f,), mid_f),
        "grn_g": 0.5 * jax.random.normal(keys[6], (1, mid_f), jnp.float32),
        "grn_b": 0.5 * jax.random.normal(keys[7], (1, mid_f), jnp.float32),
        "w3": uinit(keys[8], (out_f, mid_f), mid_f),
        "b3": uinit(keys[9], (out_f,), mid_f),
    }
    x = jax.random.normal(keys[10], (B, L, in_f), jnp.float32)

    # Case 1: in_features == out_features (identity residual).
    kp = prepare_kernel_params(raw)     # one-time prep, outside the hot path
    out = jax.block_until_ready(res_block_conv1d(x, kp))
    assert out.shape == (B, L, out_f)
    ref_m = res_block_conv1d_ref_bf16(x, raw)   # same numerics as kernel (tight check)
    ref_f = res_block_conv1d_ref_f32(x, raw)    # full-f32 semantics (loose check)
    assert jnp.allclose(out, ref_m, atol=1e-2, rtol=1e-2), "mismatch vs bf16-matched ref (identity)"
    assert jnp.allclose(out, ref_f, atol=3e-2, rtol=3e-2), "mismatch vs f32 ref (identity)"

    # Case 2: in_features != out_features (projection residual).
    out_f2 = 256
    raw2 = dict(raw)
    raw2["w3"] = uinit(keys[11], (out_f2, mid_f), mid_f)
    raw2["b3"] = uinit(keys[12], (out_f2,), mid_f)
    raw2["wp"] = uinit(keys[13], (out_f2, in_f), in_f)
    raw2["bp"] = uinit(keys[14], (out_f2,), in_f)
    kp2 = prepare_kernel_params(raw2)
    out2 = jax.block_until_ready(res_block_conv1d(x, kp2))
    assert out2.shape == (B, L, out_f2)
    ref2_m = res_block_conv1d_ref_bf16(x, raw2)
    ref2_f = res_block_conv1d_ref_f32(x, raw2)
    assert jnp.allclose(out2, ref2_m, atol=1e-2, rtol=1e-2), "mismatch vs bf16-matched ref (proj)"
    assert jnp.allclose(out2, ref2_f, atol=3e-2, rtol=3e-2), "mismatch vs f32 ref (proj)"

    print("KERNEL_OK")
</pallas_src>

<mosaic_0001>
module attributes {stable_mosaic.version = 11 : i64} {
  func.func @_res_block_kernel(%arg0: memref<32x128xf32, #tpu.memory_space<vmem>>, %arg1: memref<128x256xbf16, #tpu.memory_space<vmem>>, %arg2: memref<1x256xf32, #tpu.memory_space<vmem>>, %arg3: memref<1x256xf32, #tpu.memory_space<vmem>>, %arg4: memref<1x256xf32, #tpu.memory_space<vmem>>, %arg5: memref<256x256xbf16, #tpu.memory_space<vmem>>, %arg6: memref<1x256xf32, #tpu.memory_space<vmem>>, %arg7: memref<1x256xf32, #tpu.memory_space<vmem>>, %arg8: memref<1x256xf32, #tpu.memory_space<vmem>>, %arg9: memref<256x128xbf16, #tpu.memory_space<vmem>>, %arg10: memref<1x128xf32, #tpu.memory_space<vmem>>, %arg11: memref<32x128xf32, #tpu.memory_space<vmem>>) attributes {dimension_semantics = [], scalar_prefetch = 0 : i64, scratch_operands = 0 : i64, tpu.core_type = #tpu.core_type<tc>} {
    %c0 = arith.constant 0 : index
    %c0_0 = arith.constant 0 : index
    %0 = vector.load %arg0[%c0, %c0_0] : memref<32x128xf32, #tpu.memory_space<vmem>>, vector<32x128xf32>
    %1 = arith.truncf %0 : vector<32x128xf32> to vector<32x128xbf16>
    %c0_1 = arith.constant 0 : index
    %c0_2 = arith.constant 0 : index
    %2 = vector.load %arg1[%c0_1, %c0_2] : memref<128x256xbf16, #tpu.memory_space<vmem>>, vector<128x256xbf16>
    %cst = arith.constant dense<0.000000e+00> : vector<32x256xf32>
    %3 = tpu.matmul %1, %2, %cst {dimension_numbers = #tpu.dot_dimension_numbers<[1], [0], [0], [1], [0, 0, 1, 1], [], []>} : vector<32x128xbf16>, vector<128x256xbf16>, vector<32x256xf32> -> vector<32x256xf32>
    %c0_3 = arith.constant 0 : index
    %c0_4 = arith.constant 0 : index
    %4 = vector.load %arg2[%c0_3, %c0_4] : memref<1x256xf32, #tpu.memory_space<vmem>>, vector<1x256xf32>
    %5 = vector.broadcast %4 : vector<1x256xf32> to vector<32x256xf32>
    %6 = arith.addf %3, %5 : vector<32x256xf32>
    %cst_5 = arith.constant dense<0.000000e+00> : vector<32xf32>
    %7 = vector.multi_reduction <add>, %6, %cst_5 [1] : vector<32x256xf32> to vector<32xf32>
    %8 = vector.shape_cast %7 : vector<32xf32> to vector<32x1xf32>
    %cst_6 = arith.constant 2.560000e+02 : f32
    %9 = vector.broadcast %cst_6 : f32 to vector<32x1xf32>
    %10 = arith.divf %8, %9 : vector<32x1xf32>
    %11 = vector.broadcast %10 : vector<32x1xf32> to vector<32x256xf32>
    %12 = arith.subf %6, %11 : vector<32x256xf32>
    %13 = arith.mulf %12, %12 : vector<32x256xf32>
    %cst_7 = arith.constant dense<0.000000e+00> : vector<32xf32>
    %14 = vector.multi_reduction <add>, %13, %cst_7 [1] : vector<32x256xf32> to vector<32xf32>
    %15 = vector.shape_cast %14 : vector<32xf32> to vector<32x1xf32>
    %cst_8 = arith.constant 2.560000e+02 : f32
    %16 = vector.broadcast %cst_8 : f32 to vector<32x1xf32>
    %17 = arith.divf %15, %16 : vector<32x1xf32>
    %18 = vector.broadcast %10 : vector<32x1xf32> to vector<32x256xf32>
    %19 = arith.subf %6, %18 : vector<32x256xf32>
    %cst_9 = arith.constant 9.99999974E-6 : f32
    %20 = vector.broadcast %cst_9 : f32 to vector<32x1xf32>
    %21 = arith.addf %17, %20 : vector<32x1xf32>
    %22 = math.rsqrt %21 : vector<32x1xf32>
    %23 = vector.broadcast %22 : vector<32x1xf32> to vector<32x256xf32>
    %24 = arith.mulf %19, %23 : vector<32x256xf32>
    %c0_10 = arith.constant 0 : index
    %c0_11 = arith.constant 0 : index
    %25 = vector.load %arg3[%c0_10, %c0_11] : memref<1x256xf32, #tpu.memory_space<vmem>>, vector<1x256xf32>
    %26 = vector.broadcast %25 : vector<1x256xf32> to vector<32x256xf32>
    %27 = arith.mulf %24, %26 : vector<32x256xf32>
    %c0_12 = arith.constant 0 : index
    %c0_13 = arith.constant 0 : index
    %28 = vector.load %arg4[%c0_12, %c0_13] : memref<1x256xf32, #tpu.memory_space<vmem>>, vector<1x256xf32>
    %29 = vector.broadcast %28 : vector<1x256xf32> to vector<32x256xf32>
    %30 = arith.addf %27, %29 : vector<32x256xf32>
    %31 = arith.truncf %30 : vector<32x256xf32> to vector<32x256xbf16>
    %c0_14 = arith.constant 0 : index
    %c0_15 = arith.constant 0 : index
    %32 = vector.load %arg5[%c0_14, %c0_15] : memref<256x256xbf16, #tpu.memory_space<vmem>>, vector<256x256xbf16>
    %cst_16 = arith.constant dense<0.000000e+00> : vector<32x256xf32>
    %33 = tpu.matmul %31, %32, %cst_16 {dimension_numbers = #tpu.dot_dimension_numbers<[1], [0], [0], [1], [0, 0, 1, 1], [], []>} : vector<32x256xbf16>, vector<256x256xbf16>, vector<32x256xf32> -> vector<32x256xf32>
    %c0_17 = arith.constant 0 : index
    %c0_18 = arith.constant 0 : index
    %34 = vector.load %arg6[%c0_17, %c0_18] : memref<1x256xf32, #tpu.memory_space<vmem>>, vector<1x256xf32>
    %35 = vector.broadcast %34 : vector<1x256xf32> to vector<32x256xf32>
    %36 = arith.addf %33, %35 : vector<32x256xf32>
    %cst_19 = arith.constant 5.000000e-01 : f32
    %37 = vector.broadcast %cst_19 : f32 to vector<32x256xf32>
    %38 = arith.mulf %37, %36 : vector<32x256xf32>
    %cst_20 = arith.constant 0.707106769 : f32
    %39 = vector.broadcast %cst_20 : f32 to vector<32x256xf32>
    %40 = arith.mulf %36, %39 : vector<32x256xf32>
    %cst_21 = arith.constant 0.000000e+00 : f32
    %41 = vector.broadcast %cst_21 : f32 to vector<32x256xf32>
    %42 = arith.cmpf oge, %40, %41 : vector<32x256xf32>
    %cst_22 = arith.constant 1.000000e+00 : f32
    %cst_23 = arith.constant -1.000000e+00 : f32
    %43 = vector.broadcast %cst_22 : f32 to vector<32x256xf32>
    %44 = vector.broadcast %cst_23 : f32 to vector<32x256xf32>
    %45 = arith.select %42, %43, %44 : vector<32x256xi1>, vector<32x256xf32>
    %46 = math.absf %40 : vector<32x256xf32>
    %cst_24 = arith.constant 0.327591091 : f32
    %47 = vector.broadcast %cst_24 : f32 to vector<32x256xf32>
    %48 = arith.mulf %47, %46 : vector<32x256xf32>
    %cst_25 = arith.constant 1.000000e+00 : f32
    %49 = vector.broadcast %cst_25 : f32 to vector<32x256xf32>
    %50 = arith.addf %49, %48 : vector<32x256xf32>
    %51 = tpu.reciprocal %50 {approx = true} : vector<32x256xf32> -> vector<32x256xf32>
    %cst_26 = arith.constant 1.06140542 : f32
    %52 = vector.broadcast %cst_26 : f32 to vector<32x256xf32>
    %53 = arith.mulf %52, %51 : vector<32x256xf32>
    %cst_27 = arith.constant -1.45315206 : f32
    %54 = vector.broadcast %cst_27 : f32 to vector<32x256xf32>
    %55 = arith.addf %53, %54 : vector<32x256xf32>
    %56 = arith.mulf %55, %51 : vector<32x256xf32>
    %cst_28 = arith.constant 1.42141378 : f32
    %57 = vector.broadcast %cst_28 : f32 to vector<32x256xf32>
    %58 = arith.addf %56, %57 : vector<32x256xf32>
    %59 = arith.mulf %58, %51 : vector<32x256xf32>
    %cst_29 = arith.constant -0.284496725 : f32
    %60 = vector.broadcast %cst_29 : f32 to vector<32x256xf32>
    %61 = arith.addf %59, %60 : vector<32x256xf32>
    %62 = arith.mulf %61, %51 : vector<32x256xf32>
    %cst_30 = arith.constant 0.254829586 : f32
    %63 = vector.broadcast %cst_30 : f32 to vector<32x256xf32>
    %64 = arith.addf %62, %63 : vector<32x256xf32>
    %65 = arith.mulf %64, %51 : vector<32x256xf32>
    %cst_31 = arith.constant 0.000000e+00 : f32
    %66 = vector.broadcast %cst_31 : f32 to vector<32x256xf32>
    %67 = arith.subf %66, %46 : vector<32x256xf32>
    %68 = arith.mulf %67, %46 : vector<32x256xf32>
    %69 = math.exp %68 : vector<32x256xf32>
    %70 = arith.mulf %65, %69 : vector<32x256xf32>
    %cst_32 = arith.constant 1.000000e+00 : f32
    %71 = vector.broadcast %cst_32 : f32 to vector<32x256xf32>
    %72 = arith.subf %71, %70 : vector<32x256xf32>
    %73 = arith.mulf %45, %72 : vector<32x256xf32>
    %cst_33 = arith.constant 1.000000e+00 : f32
    %74 = vector.broadcast %cst_33 : f32 to vector<32x256xf32>
    %75 = arith.addf %74, %73 : vector<32x256xf32>
    %76 = arith.mulf %38, %75 : vector<32x256xf32>
    %77 = vector.shape_cast %76 : vector<32x256xf32> to vector<2x16x256xf32>
    %78 = arith.mulf %77, %77 : vector<2x16x256xf32>
    %cst_34 = arith.constant dense<0.000000e+00> : vector<2x256xf32>
    %79 = vector.multi_reduction <add>, %78, %cst_34 [1] : vector<2x16x256xf32> to vector<2x256xf32>
    %80 = vector.shape_cast %79 : vector<2x256xf32> to vector<2x1x256xf32>
    %81 = math.sqrt %80 : vector<2x1x256xf32>
    %cst_35 = arith.constant dense<0.000000e+00> : vector<2x1xf32>
    %82 = vector.multi_reduction <add>, %81, %cst_35 [2] : vector<2x1x256xf32> to vector<2x1xf32>
    %83 = vector.shape_cast %82 : vector<2x1xf32> to vector<2x1x1xf32>
    %cst_36 = arith.constant 2.560000e+02 : f32
    %84 = vector.broadcast %cst_36 : f32 to vector<2x1x1xf32>
    %85 = arith.divf %83, %84 : vector<2x1x1xf32>
    %cst_37 = arith.constant 9.99999997E-7 : f32
    %86 = vector.broadcast %cst_37 : f32 to vector<2x1x1xf32>
    %87 = arith.addf %85, %86 : vector<2x1x1xf32>
    %88 = tpu.reciprocal %87 {approx = true} : vector<2x1x1xf32> -> vector<2x1x1xf32>
    %89 = vector.broadcast %88 : vector<2x1x1xf32> to vector<2x1x256xf32>
    %90 = arith.mulf %81, %89 : vector<2x1x256xf32>
    %c0_38 = arith.constant 0 : index
    %c0_39 = arith.constant 0 : index
    %91 = vector.load %arg7[%c0_38, %c0_39] : memref<1x256xf32, #tpu.memory_space<vmem>>, vector<1x256xf32>
    %92 = vector.shape_cast %91 : vector<1x256xf32> to vector<1x1x256xf32>
    %c0_40 = arith.constant 0 : index
    %c0_41 = arith.constant 0 : index
    %93 = vector.load %arg8[%c0_40, %c0_41] : memref<1x256xf32, #tpu.memory_space<vmem>>, vector<1x256xf32>
    %94 = vector.shape_cast %93 : vector<1x256xf32> to vector<1x1x256xf32>
    %95 = vector.broadcast %90 : vector<2x1x256xf32> to vector<2x16x256xf32>
    %96 = arith.mulf %77, %95 : vector<2x16x256xf32>
    %97 = vector.broadcast %92 : vector<1x1x256xf32> to vector<2x16x256xf32>
    %98 = arith.mulf %97, %96 : vector<2x16x256xf32>
    %99 = vector.broadcast %94 : vector<1x1x256xf32> to vector<2x16x256xf32>
    %100 = arith.addf %98, %99 : vector<2x16x256xf32>
    %101 = arith.addf %100, %77 : vector<2x16x256xf32>
    %102 = vector.shape_cast %101 : vector<2x16x256xf32> to vector<32x256xf32>
    %103 = arith.truncf %102 : vector<32x256xf32> to vector<32x256xbf16>
    %c0_42 = arith.constant 0 : index
    %c0_43 = arith.constant 0 : index
    %104 = vector.load %arg9[%c0_42, %c0_43] : memref<256x128xbf16, #tpu.memory_space<vmem>>, vector<256x128xbf16>
    %cst_44 = arith.constant dense<0.000000e+00> : vector<32x128xf32>
    %105 = tpu.matmul %103, %104, %cst_44 {dimension_numbers = #tpu.dot_dimension_numbers<[1], [0], [0], [1], [0, 0, 1, 1], [], []>} : vector<32x256xbf16>, vector<256x128xbf16>, vector<32x128xf32> -> vector<32x128xf32>
    %c0_45 = arith.constant 0 : index
    %c0_46 = arith.constant 0 : index
    %106 = vector.load %arg10[%c0_45, %c0_46] : memref<1x128xf32, #tpu.memory_space<vmem>>, vector<1x128xf32>
    %107 = vector.broadcast %106 : vector<1x128xf32> to vector<32x128xf32>
    %108 = arith.addf %105, %107 : vector<32x128xf32>
    %109 = arith.addf %0, %108 : vector<32x128xf32>
    %c0_47 = arith.constant 0 : index
    %c0_48 = arith.constant 0 : index
    %110 = vector.load %arg11[%c0_47, %c0_48] : memref<32x128xf32, #tpu.memory_space<vmem>>, vector<32x128xf32>
    tpu.vector_store %arg11[%c0_47, %c0_48], %109 {strides = array<i32>} : memref<32x128xf32, #tpu.memory_space<vmem>>, vector<32x128xf32>,
    return
  }
}

</mosaic_0001>

<bundles_post_ra>
// kernel: res_block_conv1d.1
= control target key start
LH: loop header
LB: loop body
LE: loop exit
PB: predicated region body
PF: predicated region fallthrough
CT: control target
= control target key end

     0   :  { %16 = vsyncpa [#allocation3], 0  ;;  %s2334_s0 = inlined_call_operand.hbm [shape: f32[32,128], index: 0, kind: input, shape index: {}]   ;;  %s2335_s1 = inlined_call_operand.hbm [shape: bf16[128,256], index: 1, kind: input, shape index: {}]   ;;  %s2336_s2 = inlined_call_operand.hbm [shape: f32[1,256], index: 2, kind: input, shape index: {}]   ;;  %s2337_s3 = inlined_call_operand.vmem [shape: f32[1,256], index: 3, kind: input, shape index: {}]   ;;  %s2338_s4 = inlined_call_operand.vmem [shape: f32[1,256], index: 4, kind: input, shape index: {}]   ;;  %s2339_s5 = inlined_call_operand.hbm [shape: bf16[256,256], index: 5, kind: input, shape index: {}]   ;;  %s2340_s6 = inlined_call_operand.hbm [shape: f32[1,256], index: 6, kind: input, shape index: {}]   ;;  %s2341_s7 = inlined_call_operand.hbm [shape: f32[1,256], index: 7, kind: input, shape index: {}]   ;;  %s2342_s8 = inlined_call_operand.hbm [shape: f32[1,256], index: 8, kind: input, shape index: {}]   ;;  %s2343_s9 = inlined_call_operand.hbm [shape: bf16[256,128], index: 9, kind: input, shape index: {}]   ;;  %s2344_s10 = inlined_call_operand.hbm [shape: f32[1,128], index: 10, kind: input, shape index: {}]   ;;  %s2345_s11 = inlined_call_operand.hbm [shape: f32[32,128], index: 11, kind: output, shape index: {}]  }
   0x1   :  { %17 = vsyncpa [#allocation6], 0 }
   0x2   :  { %18 = vsyncpa [#allocation9], 0 }
   0x3   :  { %19 = vsyncpa [#allocation12], 0 }
   0x4   :  { %20 = vsyncpa [#allocation15], 0 }
   0x5   :  { %21 = vsyncpa [#allocation4], 0  ;;  %s39_s19 = sshll.u32 %s2335_s1, 4  ;;  %s1932_s20 = smov [#allocation5]   ;;  %s40_s19 = int_to_ptr.hbm [resolvable:$true] %s39_s19 }
   0x6   :  { %s41_s21 = sshll.u32 %s1932_s20, 4  ;;  %s67_s24 = sshll.u32 %s2339_s5, 4  ;;  %s42_s21 = int_to_ptr.vmem [resolvable:$true] %s41_s21  ;;  %s68_s24 = int_to_ptr.hbm [resolvable:$true] %s67_s24 }
   0x7   :  { %s1933_s25 = smov 128   ;;  %s1934_s26 = smov 8  }
   0x8   :  { %47 = dma.hbm_to_vmem [thread:$0]  %s40_s19, 2048, %s42_s21, [#allocation6], %s1933_s25, %s1933_s25, %s1934_s26  }
   0x9   :  { %s1935_s27 = smov [#allocation8]   ;;  %s92_s1 = sshll.u32 %s2341_s7, 4  ;;  %s93_s1 = int_to_ptr.hbm [resolvable:$true] %s92_s1 }
   0xa   :  { %s69_s28 = sshll.u32 %s1935_s27, 4  ;;  %s113_s13 = sshll.u32 %s2343_s9, 4  ;;  %s70_s28 = int_to_ptr.vmem [resolvable:$true] %s69_s28  ;;  %s114_s13 = int_to_ptr.hbm [resolvable:$true] %s113_s13 }
   0xb   :  { %75 = dma.hbm_to_vmem [thread:$0]  %s68_s24, 4096, %s70_s28, [#allocation9], %s1933_s25, %s1933_s25, %s1934_s26  }
   0xc   :  { %s1936_s14 = smov [#allocation11]   ;;  %s1937_s16 = smov [#allocation14]  }
   0xd   :  { %s94_s15 = sshll.u32 %s1936_s14, 4  ;;  %s115_s17 = sshll.u32 %s1937_s16, 4  ;;  %s95_s15 = int_to_ptr.vmem [resolvable:$true] %s94_s15  ;;  %s116_s17 = int_to_ptr.vmem [resolvable:$true] %s115_s17 }
   0xe   :  { %97 = dma.hbm_to_vmem [thread:$0]  %s93_s1, 32, %s95_s15, [#allocation12]  }
   0xf   :  { %s1938_s18 = smov 64   ;;  %s1939_s7 = smov 4  }
  0x10   :  { %121 = dma.hbm_to_vmem [thread:$0]  %s114_s13, 2048, %s116_s17, [#allocation15], %s1938_s18, %s1938_s18, %s1939_s7  }
  0x11   :  { %s26_s21 = sshll.u32 %s2334_s0, 4  ;;  %s1940_s22 = smov [#allocation2]   ;;  %s27_s21 = int_to_ptr.hbm [resolvable:$true] %s26_s21 }
  0x12   :  { %s28_s23 = sshll.u32 %s1940_s22, 4  ;;  %s53_s27 = sshll.u32 %s2336_s2, 4  ;;  %s29_s23 = int_to_ptr.vmem [resolvable:$true] %s28_s23  ;;  %s54_s27 = int_to_ptr.hbm [resolvable:$true] %s53_s27 }
  0x13   :  { %34 = dma.hbm_to_vmem [thread:$0]  %s27_s21, 512, %s29_s23, [#allocation3], %s1933_s25, %s1933_s25, %s1934_s26  }
  0x14   :  { %s1941_s28 = smov [#allocation7]   ;;  %s81_s5 = sshll.u32 %s2340_s6, 4  ;;  %s82_s5 = int_to_ptr.hbm [resolvable:$true] %s81_s5 }
  0x15   :  { %s55_s29 = sshll.u32 %s1941_s28, 4  ;;  %s103_s13 = sshll.u32 %s2342_s8, 4  ;;  %s56_s29 = int_to_ptr.vmem [resolvable:$true] %s55_s29  ;;  %s104_s13 = int_to_ptr.hbm [resolvable:$true] %s103_s13 }
  0x16   :  { %58 = dma.hbm_to_vmem [thread:$0]  %s54_s27, 32, %s56_s29, [#allocation6]  }
  0x17   :  { %s1942_s14 = smov [#allocation10]   ;;  %s1943_s15 = smov [#allocation13]  }
  0x18   :  { %s83_s2 = sshll.u32 %s1942_s14, 4  ;;  %s105_s16 = sshll.u32 %s1943_s15, 4  ;;  %s84_s2 = int_to_ptr.vmem [resolvable:$true] %s83_s2  ;;  %s106_s16 = int_to_ptr.vmem [resolvable:$true] %s105_s16 }
  0x19   :  { %86 = dma.hbm_to_vmem [thread:$0]  %s82_s5, 32, %s84_s2, [#allocation9]  }
  0x1a   :  { %s127_s7 = sshll.u32 %s2344_s10, 4  ;;  %s1944_s6 = smov [#allocation16]   ;;  %s128_s7 = int_to_ptr.hbm [resolvable:$true] %s127_s7 }
  0x1b   :  { %108 = dma.hbm_to_vmem [thread:$0]  %s104_s13, 32, %s106_s16, [#allocation12]  }
  0x1c   :  { %s129_s19 = sshll.u32 %s1944_s6, 4  ;;  %s130_s19 = int_to_ptr.vmem [resolvable:$true] %s129_s19 }
  0x1d   :  { %132 = dma.hbm_to_vmem [thread:$0]  %s128_s7, 16, %s130_s19, [#allocation15]  }
  0x1e   :  { %1920 = dma.done.wait [#allocation3], 512  }
  0x1f   :  { %1921 = vsyncadd [#allocation3], 4294966784 }
  0x20   :  { %1922 = dma.done.wait [#allocation6], 2080  }
  0x21   :  { %1923 = vsyncadd [#allocation6], 4294965216 }
  0x22   :  { %1924 = dma.done.wait [#allocation9], 4128  }
  0x23   :  { %1925 = vsyncadd [#allocation9], 4294963168 }
  0x24   :  { %1926 = dma.done.wait [#allocation12], 64  }
  0x25   :  { %1927 = vsyncadd [#allocation12], 4294967232 }
  0x26   :  { %1928 = dma.done.wait [#allocation15], 2064  }
  0x27   :  { %1929 = vsyncadd [#allocation15], 4294965232  ;;  %v1343_v0 = vld [vmem:[#allocation5 + $0x70] sm:$0xf]  ;;  %v1556_v1 = vld [vmem:[#allocation5 + $0x74] sm:$0xf0] }
  0x28   :  { %v1555_v2 = vld [vmem:[#allocation5 + $0x74] sm:$0xf]  ;;  %v1344_v3 = vor.u32 %v1556_v1, %v1343_v0  ;;  %v1345_v4 = vld [vmem:[#allocation5 + $0x78] sm:$0xf0]  ;;  %v1335_v5 = vld [vmem:[#allocation5 + $0x60] sm:$0xf] }
  0x29   :  { %v1554_v6 = vld [vmem:[#allocation5 + $0x64] sm:$0xf0]  ;;  %v1348_v7 = vor.u32 %v1555_v2, %v1345_v4  ;;  %v1553_v8 = vld [vmem:[#allocation5 + $0x64] sm:$0xf]  ;;  %v1337_v9 = vld [vmem:[#allocation5 + $0x68] sm:$0xf0] }
  0x2a   :  { %277 = vmatpush.bf16.msra.mxu0 %v1344_v3  ;;  %v1336_v10 = vor.u32 %v1554_v6, %v1335_v5  ;;  %v1340_v11 = vor.u32 %v1553_v8, %v1337_v9  ;;  %v1327_v12 = vld [vmem:[#allocation5 + $0x50] sm:$0xf]  ;;  %v1552_v13 = vld [vmem:[#allocation5 + $0x54] sm:$0xf0]  ;;  %v1551_v14 = vld [vmem:[#allocation5 + $0x54] sm:$0xf] }
  0x2b   :  { %296 = vmatpush.bf16.msra.mxu1 %v1348_v7  ;;  %v1329_v15 = vld [vmem:[#allocation5 + $0x58] sm:$0xf0]  ;;  %v1328_v16 = vor.u32 %v1552_v13, %v1327_v12  ;;  %v1319_v18 = vld [vmem:[#allocation5 + $0x40] sm:$0xf]  ;;  %v1550_v19 = vld [vmem:[#allocation5 + $0x44] sm:$0xf0] }
  0x2c   :  { %v1332_v17 = vor.u32 %v1551_v14, %v1329_v15  ;;  %v1549_v20 = vld [vmem:[#allocation5 + $0x44] sm:$0xf]  ;;  %v1321_v21 = vld [vmem:[#allocation5 + $0x48] sm:$0xf0]  ;;  %v1320_v22 = vor.u32 %v1550_v19, %v1319_v18  ;;  %v1311_v24 = vld [vmem:[#allocation5 + $0x30] sm:$0xf] }
  0x2d   :  { %v1324_v23 = vor.u32 %v1549_v20, %v1321_v21  ;;  %v1548_v25 = vld [vmem:[#allocation5 + $0x34] sm:$0xf0]  ;;  %v1547_v26 = vld [vmem:[#allocation5 + $0x34] sm:$0xf]  ;;  %v1313_v27 = vld [vmem:[#allocation5 + $0x38] sm:$0xf0] }
  0x2e   :  { %278 = vmatpush.bf16.msra.mxu0 %v1336_v10  ;;  %v1312_v28 = vor.u32 %v1548_v25, %v1311_v24  ;;  %v1316_v29 = vor.u32 %v1547_v26, %v1313_v27  ;;  %v1303_v30 = vld [vmem:[#allocation5 + $0x20] sm:$0xf]  ;;  %v1546_v31 = vld [vmem:[#allocation5 + $0x24] sm:$0xf0]  ;;  %v1545_v32 = vld [vmem:[#allocation5 + $0x24] sm:$0xf] }
  0x2f   :  { %297 = vmatpush.bf16.msra.mxu1 %v1340_v11  ;;  %v1305_v33 = vld [vmem:[#allocation5 + $0x28] sm:$0xf0]  ;;  %v1304_v34 = vor.u32 %v1546_v31, %v1303_v30  ;;  %v1295_v36 = vld [vmem:[#allocation5 + $0x10] sm:$0xf]  ;;  %v1544_v37 = vld [vmem:[#allocation5 + $0x14] sm:$0xf0] }
  0x30   :  { %v1308_v35 = vor.u32 %v1545_v32, %v1305_v33  ;;  %v1543_v38 = vld [vmem:[#allocation5 + $0x14] sm:$0xf]  ;;  %v1297_v39 = vld [vmem:[#allocation5 + $0x18] sm:$0xf0]  ;;  %v1296_v40 = vor.u32 %v1544_v37, %v1295_v36  ;;  %v1287_v42 = vld [vmem:[#allocation5] sm:$0xf] }
  0x31   :  { %v1300_v41 = vor.u32 %v1543_v38, %v1297_v39  ;;  %v1542_v43 = vld [vmem:[#allocation5 + $0x4] sm:$0xf0]  ;;  %v1541_v44 = vld [vmem:[#allocation5 + $0x4] sm:$0xf]  ;;  %v1289_v45 = vld [vmem:[#allocation5 + $0x8] sm:$0xf0] }
  0x32   :  { %279 = vmatpush.bf16.msra.mxu0 %v1328_v16  ;;  %v1288_v46 = vor.u32 %v1542_v43, %v1287_v42  ;;  %v169_v47 = vld [vmem:[#allocation2] sm:$0xff]  ;;  %v170_v48 = vld [vmem:[#allocation2 + $0x8] sm:$0xff]  ;;  %v1292_v49 = vor.u32 %v1541_v44, %v1289_v45  ;;  %v171_v51 = vld [vmem:[#allocation2 + $0x10] sm:$0xff]  ;;  %v1945_v13 = vmov 256.0   ;;  %s1268_s9 = sshll.u32 %s2345_s11, 4  ;;  %s1269_s9 = int_to_ptr.hbm [resolvable:$true] %s1268_s9 }
  0x33   :  { %298 = vmatpush.bf16.msra.mxu1 %v1332_v17  ;;  %v173_v50 = vpack.c.bf16 %v170_v48, %v169_v47  ;;  %v172_v52 = vld [vmem:[#allocation2 + $0x18] sm:$0xff]  ;;  %v191_v54 = vld [vmem:[#allocation7] sm:$0x3]  ;;  %1622 = vrcp.f32 %v1945_v13  ;;  %v1407_v48 = vld [vmem:[#allocation8 + $0x70] sm:$0xf] }
  0x34   :  { %v174_v53 = vpack.c.bf16 %v172_v52, %v171_v51  ;;  %v193_v55 = vperm.slane %v191_v54, 0  ;;  %v194_v56 = vperm.slane %v191_v54, 1  ;;  %v1588_v52 = vld [vmem:[#allocation8 + $0xf4] sm:$0xf0]  ;;  %v1409_v54 = vld [vmem:[#allocation8 + $0x78] sm:$0xf0] }
  0x35   :  { %v1567_v13 = vld [vmem:[#allocation8 + $0x54] sm:$0xf] }
  0x36   :  { %280 = vmatpush.bf16.msra.mxu0 %v1320_v22 }
  0x37   :  { %299 = vmatpush.bf16.msra.mxu1 %v1324_v23 }
  0x39   :  { %v1623_v14 = vpop.eup %1622 }
  0x3a   :  { %281 = vmatpush.bf16.msra.mxu0 %v1312_v28  ;;  %v328_v15 = vmul.f32 256.0, %v1623_v14  ;;  %vm332_vm0 = vweird.f32 %v1623_v14 }
  0x3b   :  { %300 = vmatpush.bf16.msra.mxu1 %v1316_v29 }
  0x3c   :  { %v329_v16 = vsub.f32 1.0, %v328_v15 }
  0x3e   :  { %282 = vmatpush.bf16.msra.mxu0 %v1304_v34  ;;  %v330_v17 = vmul.f32 %v1623_v14, %v329_v16 }
  0x3f   :  { %301 = vmatpush.bf16.msra.mxu1 %v1308_v35 }
  0x40   :  { %v331_v18 = vadd.f32 %v1623_v14, %v330_v17  ;;  %v1583_v17 = vld [vmem:[#allocation8 + $0xd4] sm:$0xf] }
  0x42   :  { %283 = vmatpush.bf16.msra.mxu0 %v1296_v40  ;;  %v2044_v19 = vsel %vm332_vm0, %v1623_v14, %v331_v18  ;;  %v1393_v14 = vld [vmem:[#allocation8 + $0x58] sm:$0xf0] }
  0x43   :  { %302 = vmatpush.bf16.msra.mxu1 %v1300_v41  ;;  %v1396_v16 = vor.u32 %v1567_v13, %v1393_v14  ;;  %v1457_v18 = vld [vmem:[#allocation8 + $0xd8] sm:$0xf0] }
  0x46   :  { %284 = vmatpush.bf16.msra.mxu0 %v1288_v46 }
  0x47   :  { %303 = vmatpush.bf16.msra.mxu1 %v1292_v49  ;;  %v1572_v49 = vld [vmem:[#allocation8 + $0x74] sm:$0xf0] }
  0x48   :  { %v1408_v51 = vor.u32 %v1572_v49, %v1407_v48 }
  0x49   :  { %285 = vmatmul.bf16.vlgmr.msra.gmra.mxu0 %v173_v50 }
  0x4a   :  { %304 = vmatmul.bf16.vlgmr.msra.gmra.mxu1 %v173_v50  ;;  %v1471_v50 = vld [vmem:[#allocation8 + $0xf0] sm:$0xf]  ;;  %652 = vmatpush.bf16.msra.mxu2 %v1408_v51  ;;  %v1441_v51 = vld [vmem:[#allocation8 + $0xb8] sm:$0xf0] }
  0x59   :  { %290 = vmatmul.bf16.gmra.mxu0 %v174_v53 }
  0x5a   :  { %309 = vmatmul.bf16.gmra.mxu1 %v174_v53  ;;  %v1571_v53 = vld [vmem:[#allocation8 + $0x74] sm:$0xf] }
  0xc6   :  { %v286_v57 = vpop.f32.mrf.mxu0 }
  0xc7   :  { %v287_v58 = vadd.f32 %v286_v57, %v193_v55  ;;  %v305_v59 = vpop.f32.mrf.mxu1  ;;  %v1587_v57 = vld [vmem:[#allocation8 + $0xf4] sm:$0xf] }
  0xc8   :  { %v306_v60 = vadd.f32 %v305_v59, %v194_v56 }
  0xca   :  { %v315_v61 = vadd.f32 %v306_v60, %v287_v58 }
  0xcc   :  { %316 = vadd.xlane.f32.xlu0 %v315_v61  ;;  %v1570_v61 = vld [vmem:[#allocation8 + $0x64] sm:$0xf0] }
  0xce   :  { %v288_v62 = vpop.f32.mrf.mxu0 }
  0xcf   :  { %v289_v63 = vadd.f32 %v288_v62, %v193_v55  ;;  %v307_v0 = vpop.f32.mrf.mxu1  ;;  %v1463_v62 = vld [vmem:[#allocation8 + $0xe0] sm:$0xf] }
  0xd0   :  { %v308_v1 = vadd.f32 %v307_v0, %v194_v56  ;;  %v1586_v0 = vld [vmem:[#allocation8 + $0xe4] sm:$0xf0] }
  0xd2   :  { %v318_v2 = vadd.f32 %v308_v1, %v289_v63 }
  0xd4   :  { %319 = vadd.xlane.f32.xlu0 %v318_v2  ;;  %v1401_v2 = vld [vmem:[#allocation8 + $0x68] sm:$0xf0] }
  0xd6   :  { %v291_v3 = vpop.f32.mrf.mxu0 }
  0xd7   :  { %v292_v4 = vadd.f32 %v291_v3, %v193_v55  ;;  %v310_v5 = vpop.f32.mrf.mxu1  ;;  %v1464_v3 = vor.u32 %v1586_v0, %v1463_v62  ;;  %v1577_v62 = vld [vmem:[#allocation8 + $0xa4] sm:$0xf] }
  0xd8   :  { %v311_v6 = vadd.f32 %v310_v5, %v194_v56  ;;  %v1585_v5 = vld [vmem:[#allocation8 + $0xe4] sm:$0xf] }
  0xda   :  { %v321_v7 = vadd.f32 %v311_v6, %v292_v4 }
  0xdc   :  { %322 = vadd.xlane.f32.xlu1 %v321_v7 }
  0xde   :  { %v293_v8 = vpop.f32.mrf.mxu0 }
  0xdf   :  { %v294_v9 = vadd.f32 %v293_v8, %v193_v55  ;;  %v312_v10 = vpop.f32.mrf.mxu1  ;;  %v1472_v55 = vor.u32 %v1588_v52, %v1471_v50  ;;  %v1391_v8 = vld [vmem:[#allocation8 + $0x50] sm:$0xf]  ;;  %v1579_v50 = vld [vmem:[#allocation8 + $0xb4] sm:$0xf] }
  0xe0   :  { %v313_v11 = vadd.f32 %v312_v10, %v194_v56  ;;  %v1412_v56 = vor.u32 %v1571_v53, %v1409_v54  ;;  %v1455_v10 = vld [vmem:[#allocation8 + $0xd0] sm:$0xf]  ;;  %v1444_v52 = vor.u32 %v1579_v50, %v1441_v51  ;;  %v1367_v53 = vld [vmem:[#allocation8 + $0x20] sm:$0xf]  ;;  %v1562_v54 = vld [vmem:[#allocation8 + $0x24] sm:$0xf0] }
  0xe1   :  { %671 = vmatpush.bf16.msra.mxu3 %v1472_v55  ;;  %v1431_v55 = vld [vmem:[#allocation8 + $0xa0] sm:$0xf] }
  0xe2   :  { %v324_v12 = vadd.f32 %v313_v11, %v294_v9  ;;  %690 = vmatpush.bf16.msrb.mxu0 %v1412_v56  ;;  %v1368_v56 = vor.u32 %v1562_v54, %v1367_v53 }
  0xe4   :  { %325 = vadd.xlane.f32.xlu1 %v324_v12  ;;  %v1584_v12 = vld [vmem:[#allocation8 + $0xd4] sm:$0xf0] }
  0xe5   :  { %672 = vmatpush.bf16.msra.mxu3 %v1464_v3  ;;  %v1456_v15 = vor.u32 %v1584_v12, %v1455_v10  ;;  %v1423_v3 = vld [vmem:[#allocation8 + $0x90] sm:$0xf]  ;;  %v1575_v10 = vld [vmem:[#allocation8 + $0x94] sm:$0xf] }
  0xe9   :  { %673 = vmatpush.bf16.msra.mxu3 %v1456_v15  ;;  %v1351_v15 = vld [vmem:[#allocation8] sm:$0xf] }
 0x13f   :  { %v317_v20 = vpop.xlane.xlu0 %316 }
 0x140   :  { %v334_v21 = vmul.f32 %v2044_v19, %v317_v20  ;;  %v1460_v20 = vor.u32 %v1583_v17, %v1457_v18  ;;  %v1415_v17 = vld [vmem:[#allocation8 + $0x80] sm:$0xf] }
 0x142   :  { %v2047_v22 = vsub.f32 %v287_v58, %v334_v21  ;;  %v2049_v23 = vsub.f32 %v306_v60, %v334_v21  ;;  %v1473_v58 = vld [vmem:[#allocation8 + $0xf8] sm:$0xf0]  ;;  %v1399_v60 = vld [vmem:[#allocation8 + $0x60] sm:$0xf] }
 0x143   :  { %v1476_v59 = vor.u32 %v1587_v57, %v1473_v58  ;;  %v1383_v21 = vld [vmem:[#allocation8 + $0x40] sm:$0xf]  ;;  %v1578_v57 = vld [vmem:[#allocation8 + $0xa4] sm:$0xf0]  ;;  %v1561_v58 = vld [vmem:[#allocation8 + $0x24] sm:$0xf] }
 0x144   :  { %v346_v24 = vmul.f32 %v2047_v22, %v2047_v22  ;;  %v347_v25 = vmul.f32 %v2049_v23, %v2049_v23 }
 0x145   :  { %709 = vmatpush.bf16.msrb.mxu1 %v1476_v59  ;;  %v1369_v59 = vld [vmem:[#allocation8 + $0x28] sm:$0xf0] }
 0x146   :  { %v354_v26 = vadd.f32 %v347_v25, %v346_v24  ;;  %v1566_v24 = vld [vmem:[#allocation8 + $0x44] sm:$0xf0]  ;;  %v1447_v25 = vld [vmem:[#allocation8 + $0xc0] sm:$0xf] }
 0x147   :  { %v320_v27 = vpop.xlane.xlu0 %319 }
 0x148   :  { %v335_v28 = vmul.f32 %v2044_v19, %v320_v27  ;;  %355 = vadd.xlane.f32.xlu2 %v354_v26  ;;  %v1384_v26 = vor.u32 %v1566_v24, %v1383_v21  ;;  %v1582_v27 = vld [vmem:[#allocation8 + $0xc4] sm:$0xf0]  ;;  %v1557_v21 = vld [vmem:[#allocation8 + $0x4] sm:$0xf]  ;;  %v1353_v24 = vld [vmem:[#allocation8 + $0x8] sm:$0xf0] }
 0x14a   :  { %v2056_v29 = vsub.f32 %v289_v63, %v335_v28  ;;  %v2058_v30 = vsub.f32 %v308_v1, %v335_v28  ;;  %v1400_v63 = vor.u32 %v1570_v61, %v1399_v60  ;;  %v1569_v1 = vld [vmem:[#allocation8 + $0x64] sm:$0xf]  ;;  %v1432_v60 = vor.u32 %v1578_v57, %v1431_v55 }
 0x14b   :  { %v1565_v28 = vld [vmem:[#allocation8 + $0x44] sm:$0xf]  ;;  %v1372_v61 = vor.u32 %v1561_v58, %v1369_v59 }
 0x14c   :  { %v348_v31 = vmul.f32 %v2056_v29, %v2056_v29  ;;  %v349_v32 = vmul.f32 %v2058_v30, %v2058_v30  ;;  %653 = vmatpush.bf16.msra.mxu2 %v1400_v63  ;;  %v1433_v63 = vld [vmem:[#allocation8 + $0xa8] sm:$0xf0] }
 0x14d   :  { %v1436_v0 = vor.u32 %v1577_v62, %v1433_v63  ;;  %v436_v62 = vld [vmem:[%s2338_s4] sm:$0x3] }
 0x14e   :  { %v357_v33 = vadd.f32 %v349_v32, %v348_v31  ;;  %v1385_v31 = vld [vmem:[#allocation8 + $0x48] sm:$0xf0]  ;;  %v1448_v32 = vor.u32 %v1582_v27, %v1447_v25  ;;  %v1356_v27 = vor.u32 %v1557_v21, %v1353_v24 }
 0x14f   :  { %v323_v34 = vpop.xlane.xlu1 %322 }
 0x150   :  { %v336_v35 = vmul.f32 %v2044_v19, %v323_v34  ;;  %358 = vadd.xlane.f32.xlu2 %v357_v33  ;;  %v1388_v33 = vor.u32 %v1565_v28, %v1385_v31  ;;  %v1581_v34 = vld [vmem:[#allocation8 + $0xc4] sm:$0xf]  ;;  %674 = vmatpush.bf16.msra.mxu3 %v1448_v32  ;;  %v1417_v31 = vld [vmem:[#allocation8 + $0x88] sm:$0xf0] }
 0x151   :  { %v1573_v28 = vld [vmem:[#allocation8 + $0x84] sm:$0xf] }
 0x152   :  { %v2065_v36 = vsub.f32 %v292_v4, %v336_v35  ;;  %v2067_v37 = vsub.f32 %v311_v6, %v336_v35  ;;  %v1404_v4 = vor.u32 %v1569_v1, %v1401_v2  ;;  %v1465_v6 = vld [vmem:[#allocation8 + $0xe8] sm:$0xf0]  ;;  %v1359_v1 = vld [vmem:[#allocation8 + $0x10] sm:$0xf]  ;;  %v1560_v2 = vld [vmem:[#allocation8 + $0x14] sm:$0xf0]  ;;  %v1420_v32 = vor.u32 %v1573_v28, %v1417_v31 }
 0x153   :  { %v1468_v7 = vor.u32 %v1585_v5, %v1465_v6  ;;  %v1449_v35 = vld [vmem:[#allocation8 + $0xc8] sm:$0xf0]  ;;  %v1576_v5 = vld [vmem:[#allocation8 + $0x94] sm:$0xf0]  ;;  %v1559_v6 = vld [vmem:[#allocation8 + $0x14] sm:$0xf] }
 0x154   :  { %v350_v38 = vmul.f32 %v2065_v36, %v2065_v36  ;;  %v351_v39 = vmul.f32 %v2067_v37, %v2067_v37  ;;  %691 = vmatpush.bf16.msrb.mxu0 %v1404_v4  ;;  %v1360_v4 = vor.u32 %v1560_v2, %v1359_v1 }
 0x155   :  { %710 = vmatpush.bf16.msrb.mxu1 %v1468_v7  ;;  %v1361_v7 = vld [vmem:[#allocation8 + $0x18] sm:$0xf0] }
 0x156   :  { %v360_v40 = vadd.f32 %v351_v39, %v350_v38  ;;  %v1452_v38 = vor.u32 %v1581_v34, %v1449_v35  ;;  %v1375_v39 = vld [vmem:[#allocation8 + $0x30] sm:$0xf] }
 0x157   :  { %v326_v41 = vpop.xlane.xlu1 %325 }
 0x158   :  { %v337_v42 = vmul.f32 %v2044_v19, %v326_v41  ;;  %361 = vadd.xlane.f32.xlu0 %v360_v40  ;;  %692 = vmatpush.bf16.msrb.mxu0 %v1396_v16  ;;  %v1564_v40 = vld [vmem:[#allocation8 + $0x34] sm:$0xf0]  ;;  %v1439_v41 = vld [vmem:[#allocation8 + $0xb0] sm:$0xf]  ;;  %v1558_v16 = vld [vmem:[#allocation8 + $0x4] sm:$0xf0] }
 0x159   :  { %711 = vmatpush.bf16.msrb.mxu1 %v1460_v20  ;;  %v1352_v18 = vor.u32 %v1558_v16, %v1351_v15  ;;  %v1574_v20 = vld [vmem:[#allocation8 + $0x84] sm:$0xf0] }
 0x15a   :  { %v2074_v43 = vsub.f32 %v294_v9, %v337_v42  ;;  %v2076_v44 = vsub.f32 %v313_v11, %v337_v42  ;;  %v1568_v9 = vld [vmem:[#allocation8 + $0x54] sm:$0xf0]  ;;  %v1376_v42 = vor.u32 %v1564_v40, %v1375_v39 }
 0x15b   :  { %v1392_v11 = vor.u32 %v1568_v9, %v1391_v8  ;;  %v1424_v8 = vor.u32 %v1576_v5, %v1423_v3  ;;  %v1364_v9 = vor.u32 %v1559_v6, %v1361_v7  ;;  %v438_v5 = vperm.slane %v436_v62, 0 }
 0x15c   :  { %v352_v45 = vmul.f32 %v2074_v43, %v2074_v43  ;;  %v353_v46 = vmul.f32 %v2076_v44, %v2076_v44  ;;  %693 = vmatpush.bf16.msrb.mxu0 %v1388_v33  ;;  %v439_v6 = vperm.slane %v436_v62, 1 }
 0x15d   :  { %654 = vmatpush.bf16.msra.mxu2 %v1392_v11  ;;  %712 = vmatpush.bf16.msrb.mxu1 %v1452_v38  ;;  %v1425_v11 = vld [vmem:[#allocation8 + $0x98] sm:$0xf0] }
 0x15e   :  { %v363_v47 = vadd.f32 %v353_v46, %v352_v45  ;;  %v1580_v45 = vld [vmem:[#allocation8 + $0xb4] sm:$0xf0]  ;;  %v1563_v46 = vld [vmem:[#allocation8 + $0x34] sm:$0xf]  ;;  %v1428_v13 = vor.u32 %v1575_v10, %v1425_v11 }
 0x15f   :  { %v1440_v48 = vor.u32 %v1580_v45, %v1439_v41 }
 0x160   :  { %364 = vadd.xlane.f32.xlu1 %v363_v47  ;;  %v1377_v47 = vld [vmem:[#allocation8 + $0x38] sm:$0xf0] }
 0x161   :  { %655 = vmatpush.bf16.msra.mxu2 %v1384_v26  ;;  %v1380_v49 = vor.u32 %v1563_v46, %v1377_v47  ;;  %675 = vmatpush.bf16.msra.mxu3 %v1440_v48  ;;  %v1416_v26 = vor.u32 %v1574_v20, %v1415_v17 }
 0x162   :  { %713 = vmatpush.bf16.msrb.mxu1 %v1444_v52  ;;  %v422_v52 = vld [vmem:[%s2337_s3] sm:$0x3]  ;;  %s1947_s3 = smov [#allocation17]  }
 0x163   :  { %694 = vmatpush.bf16.msrb.mxu0 %v1380_v49  ;;  %v424_v58 = vperm.slane %v422_v52, 0  ;;  %s1266_s4 = sshll.u32 %s1947_s3, 4  ;;  %s1267_s4 = int_to_ptr.vmem [resolvable:$true] %s1266_s4 }
 0x165   :  { %656 = vmatpush.bf16.msra.mxu2 %v1376_v42  ;;  %676 = vmatpush.bf16.msra.mxu3 %v1432_v60 }
 0x166   :  { %714 = vmatpush.bf16.msrb.mxu1 %v1436_v0  ;;  %v425_v0 = vperm.slane %v422_v52, 1 }
 0x167   :  { %695 = vmatpush.bf16.msrb.mxu0 %v1372_v61 }
 0x169   :  { %657 = vmatpush.bf16.msra.mxu2 %v1368_v56  ;;  %677 = vmatpush.bf16.msra.mxu3 %v1424_v8 }
 0x16a   :  { %715 = vmatpush.bf16.msrb.mxu1 %v1428_v13 }
 0x16b   :  { %696 = vmatpush.bf16.msrb.mxu0 %v1364_v9 }
 0x16d   :  { %658 = vmatpush.bf16.msra.mxu2 %v1360_v4  ;;  %678 = vmatpush.bf16.msra.mxu3 %v1416_v26 }
 0x16e   :  { %716 = vmatpush.bf16.msrb.mxu1 %v1420_v32 }
 0x16f   :  { %697 = vmatpush.bf16.msrb.mxu0 %v1356_v27 }
 0x171   :  { %659 = vmatpush.bf16.msra.mxu2 %v1352_v18 }
 0x1bb   :  { %v356_v12 = vpop.xlane.xlu2 %355 }
 0x1bc   :  { %v366_v14 = vmul.f32 %v356_v12, %v2044_v19 }
 0x1be   :  { %v370_v25 = vadd.f32 1e-05, %v366_v14 }
 0x1c0   :  { %1624 = vrsqrt.f32 %v370_v25  ;;  %vm380_vm2 = vweird.f32 %v370_v25 }
 0x1c3   :  { %v359_v33 = vpop.xlane.xlu2 %358 }
 0x1c4   :  { %v367_v34 = vmul.f32 %v359_v33, %v2044_v19 }
 0x1c6   :  { %v1625_v35 = vpop.eup %1624  ;;  %v371_v38 = vadd.f32 1e-05, %v367_v34 }
 0x1c7   :  { %v375_v39 = vmul.f32 %v1625_v35, %v370_v25  ;;  %vm381_vm1 = vweird.f32 %v1625_v35 }
 0x1c8   :  { %1626 = vrsqrt.f32 %v371_v38  ;;  %vm382_vm3 = vmor %vm380_vm2, %vm381_vm1  ;;  %vm390_vm5 = vweird.f32 %v371_v38 }
 0x1c9   :  { %v376_v40 = vmul.f32 %v1625_v35, %v375_v39 }
 0x1cb   :  { %v377_v41 = vmul.f32 0.5, %v376_v40  ;;  %v362_v42 = vpop.xlane.xlu0 %361 }
 0x1cc   :  { %v368_v45 = vmul.f32 %v362_v42, %v2044_v19 }
 0x1cd   :  { %v378_v46 = vsub.f32 1.5, %v377_v41 }
 0x1ce   :  { %v1627_v47 = vpop.eup %1626  ;;  %v372_v48 = vadd.f32 1e-05, %v368_v45 }
 0x1cf   :  { %v379_v49 = vmul.f32 %v1625_v35, %v378_v46  ;;  %v385_v50 = vmul.f32 %v1627_v47, %v371_v38  ;;  %vm391_vm4 = vweird.f32 %v1627_v47 }
 0x1d0   :  { %1628 = vrsqrt.f32 %v372_v48  ;;  %vm392_vm6 = vmor %vm390_vm5, %vm391_vm4  ;;  %vm400_vm8 = vweird.f32 %v372_v48 }
 0x1d1   :  { %v386_v51 = vmul.f32 %v1627_v47, %v385_v50  ;;  %v383_v55 = vsel %vm382_vm3, %v1625_v35, %v379_v49 }
 0x1d2   :  { %v414_v61 = vmul.f32 %v383_v55, %v2047_v22  ;;  %v415_v63 = vmul.f32 %v383_v55, %v2049_v23 }
 0x1d3   :  { %v387_v53 = vmul.f32 0.5, %v386_v51  ;;  %v365_v54 = vpop.xlane.xlu1 %364 }
 0x1d4   :  { %v369_v56 = vmul.f32 %v365_v54, %v2044_v19  ;;  %v428_v8 = vmul.f32 %v424_v58, %v414_v61  ;;  %v429_v9 = vmul.f32 %v425_v0, %v415_v63 }
 0x1d5   :  { %v388_v57 = vsub.f32 1.5, %v387_v53 }
 0x1d6   :  { %v1629_v59 = vpop.eup %1628  ;;  %v373_v60 = vadd.f32 1e-05, %v369_v56  ;;  %v442_v14 = vadd.f32 %v438_v5, %v428_v8  ;;  %v443_v16 = vadd.f32 %v439_v6, %v429_v9 }
 0x1d7   :  { %v389_v1 = vmul.f32 %v1627_v47, %v388_v57  ;;  %v395_v2 = vmul.f32 %v1629_v59, %v372_v48  ;;  %vm401_vm7 = vweird.f32 %v1629_v59 }
 0x1d8   :  { %1630 = vrsqrt.f32 %v373_v60  ;;  %vm402_vm9 = vmor %vm400_vm8, %vm401_vm7  ;;  %vm410_vm11 = vweird.f32 %v373_v60 }
 0x1d9   :  { %v396_v3 = vmul.f32 %v1629_v59, %v395_v2  ;;  %v393_v4 = vsel %vm392_vm6, %v1627_v47, %v389_v1 }
 0x1da   :  { %v416_v7 = vmul.f32 %v393_v4, %v2056_v29  ;;  %v417_v22 = vmul.f32 %v393_v4, %v2058_v30 }
 0x1db   :  { %v397_v10 = vmul.f32 0.5, %v396_v3 }
 0x1dc   :  { %v430_v11 = vmul.f32 %v424_v58, %v416_v7  ;;  %v431_v12 = vmul.f32 %v425_v0, %v417_v22 }
 0x1dd   :  { %v398_v23 = vsub.f32 1.5, %v397_v10 }
 0x1de   :  { %v1631_v13 = vpop.eup %1630  ;;  %v444_v15 = vadd.f32 %v438_v5, %v430_v11  ;;  %v445_v17 = vadd.f32 %v439_v6, %v431_v12 }
 0x1df   :  { %v399_v18 = vmul.f32 %v1629_v59, %v398_v23  ;;  %v405_v20 = vmul.f32 %v1631_v13, %v373_v60  ;;  %vm411_vm10 = vweird.f32 %v1631_v13 }
 0x1e0   :  { %v450_v21 = vpack.c.bf16 %v444_v15, %v442_v14  ;;  %v451_v24 = vpack.c.bf16 %v445_v17, %v443_v16  ;;  %vm412_vm12 = vmor %vm410_vm11, %vm411_vm10 }
 0x1e1   :  { %v406_v29 = vmul.f32 %v1631_v13, %v405_v20  ;;  %v403_v25 = vsel %vm402_vm9, %v1629_v59, %v399_v18 }
 0x1e2   :  { %660 = vmatmul.bf16.vlgmr.msra.gmra.mxu2 %v450_v21  ;;  %679 = vmatmul.bf16.vlgmr.msra.gmra.mxu3 %v451_v24  ;;  %v418_v27 = vmul.f32 %v403_v25, %v2065_v36  ;;  %v419_v28 = vmul.f32 %v403_v25, %v2067_v37  ;;  %v486_v37 = vld [vmem:[#allocation10] sm:$0x3] }
 0x1e3   :  { %v407_v30 = vmul.f32 0.5, %v406_v29  ;;  %698 = vmatmul.bf16.vlgmr.msrb.gmra.mxu0 %v450_v21  ;;  %717 = vmatmul.bf16.vlgmr.msrb.gmra.mxu1 %v451_v24  ;;  %v489_v48 = vperm.slane %v486_v37, 1  ;;  %v2100_v51 = vperm.slane %v486_v37, 0 }
 0x1e4   :  { %v432_v34 = vmul.f32 %v424_v58, %v418_v27  ;;  %v433_v38 = vmul.f32 %v425_v0, %v419_v28 }
 0x1e5   :  { %v408_v26 = vsub.f32 1.5, %v407_v30 }
 0x1e6   :  { %v446_v41 = vadd.f32 %v438_v5, %v432_v34  ;;  %v447_v45 = vadd.f32 %v439_v6, %v433_v38 }
 0x1e7   :  { %v409_v31 = vmul.f32 %v1631_v13, %v408_v26 }
 0x1e9   :  { %v413_v32 = vsel %vm412_vm12, %v1631_v13, %v409_v31 }
 0x1ea   :  { %v420_v33 = vmul.f32 %v413_v32, %v2074_v43  ;;  %v421_v35 = vmul.f32 %v413_v32, %v2076_v44 }
 0x1ec   :  { %v434_v39 = vmul.f32 %v424_v58, %v420_v33  ;;  %v435_v40 = vmul.f32 %v425_v0, %v421_v35 }
 0x1ee   :  { %v448_v42 = vadd.f32 %v438_v5, %v434_v39  ;;  %v449_v46 = vadd.f32 %v439_v6, %v435_v40 }
 0x1f0   :  { %v452_v47 = vpack.c.bf16 %v448_v42, %v446_v41  ;;  %v453_v36 = vpack.c.bf16 %v449_v46, %v447_v45 }
 0x1f2   :  { %665 = vmatmul.bf16.gmra.mxu2 %v452_v47  ;;  %684 = vmatmul.bf16.gmra.mxu3 %v453_v36 }
 0x1f3   :  { %703 = vmatmul.bf16.gmra.mxu0 %v452_v47  ;;  %722 = vmatmul.bf16.gmra.mxu1 %v453_v36 }
 0x260   :  { %v699_v49 = vpop.f32.mrf.mxu0  ;;  %v718_v43 = vpop.f32.mrf.mxu1 }
 0x261   :  { %v700_v50 = vadd.f32 %v699_v49, %v489_v48 }
 0x263   :  { %v2102_v44 = vadd.f32 %v718_v43, %v700_v50 }
 0x265   :  { %v2105_v52 = vmul.f32 0.70710677, %v2102_v44  ;;  %v661_v53 = vpop.f32.mrf.mxu2  ;;  %v680_v54 = vpop.f32.mrf.mxu3 }
 0x266   :  { %v662_v55 = vadd.f32 %v661_v53, %v2100_v51 }
 0x267   :  { %v761_v56 = vand.u32 2147483647, %v2105_v52  ;;  %vm745_vm13 = vcmp.ge.f32.partialorder %v2105_v52, 0.0 }
 0x268   :  { %v2109_v57 = vadd.f32 %v680_v54, %v662_v55  ;;  %v701_v58 = vpop.f32.mrf.mxu0  ;;  %v720_v59 = vpop.f32.mrf.mxu1 }
 0x269   :  { %v769_v60 = vmul.f32 0.3275911, %v761_v56  ;;  %v702_v61 = vadd.f32 %v701_v58, %v489_v48  ;;  %v865_v7 = vsub.f32 0.0, %v761_v56 }
 0x26a   :  { %v2112_v62 = vmul.f32 0.70710677, %v2109_v57 }
 0x26b   :  { %v777_v63 = vadd.f32 1.0, %v769_v60  ;;  %v2114_v0 = vadd.f32 %v720_v59, %v702_v61  ;;  %v873_v17 = vmul.f32 %v865_v7, %v761_v56  ;;  %v2158_v61 = vmul.f32 0.5, %v2102_v44 }
 0x26c   :  { %v760_v1 = vand.u32 2147483647, %v2112_v62  ;;  %vm744_vm14 = vcmp.ge.f32.partialorder %v2112_v62, 0.0 }
 0x26d   :  { %1632 = vrcp.f32 %v777_v63  ;;  %v663_v2 = vpop.f32.mrf.mxu2  ;;  %v2118_v4 = vmul.f32 0.70710677, %v2114_v0  ;;  %v682_v6 = vpop.f32.mrf.mxu3  ;;  %v882_v31 = vmul.f32 1.442695, %v873_v17 }
 0x26e   :  { %v768_v3 = vmul.f32 0.3275911, %v760_v1  ;;  %v664_v5 = vadd.f32 %v663_v2, %v2100_v51  ;;  %v864_v30 = vsub.f32 0.0, %v760_v1 }
 0x26f   :  { %v763_v22 = vand.u32 2147483647, %v2118_v4  ;;  %vm747_vm15 = vcmp.ge.f32.partialorder %v2118_v4, 0.0 }
 0x270   :  { %v776_v8 = vadd.f32 1.0, %v768_v3  ;;  %v704_v9 = vpop.f32.mrf.mxu0  ;;  %v2122_v10 = vadd.f32 %v682_v6, %v664_v5  ;;  %v723_v23 = vpop.f32.mrf.mxu1  ;;  %v872_v41 = vmul.f32 %v864_v30, %v760_v1 }
 0x271   :  { %v705_v11 = vadd.f32 %v704_v9, %v489_v48  ;;  %v771_v12 = vmul.f32 0.3275911, %v763_v22  ;;  %v867_v47 = vsub.f32 0.0, %v763_v22 }
 0x272   :  { %1634 = vrcp.f32 %v776_v8  ;;  %v2127_v14 = vmul.f32 0.70710677, %v2122_v10  ;;  %v880_v58 = vmul.f32 1.442695, %v872_v41 }
 0x273   :  { %v2124_v13 = vpop.eup %1632  ;;  %v2129_v15 = vadd.f32 %v723_v23, %v705_v11  ;;  %v779_v18 = vadd.f32 1.0, %v771_v12  ;;  %v875_v60 = vmul.f32 %v867_v47, %v763_v22 }
 0x274   :  { %v793_v16 = vmul.f32 1.0614054, %v2124_v13  ;;  %v762_v20 = vand.u32 2147483647, %v2127_v14  ;;  %vm746_vm0 = vcmp.ge.f32.partialorder %v2127_v14, 0.0 }
 0x275   :  { %v2134_v21 = vmul.f32 0.70710677, %v2129_v15  ;;  %v666_v24 = vpop.f32.mrf.mxu2  ;;  %1636 = vrcp.f32 %v779_v18  ;;  %v685_v39 = vpop.f32.mrf.mxu3 }
 0x276   :  { %v801_v29 = vadd.f32 -1.4531521, %v793_v16  ;;  %v770_v25 = vmul.f32 0.3275911, %v762_v20  ;;  %v667_v32 = vadd.f32 %v666_v24, %v2100_v51  ;;  %v866_v1 = vsub.f32 0.0, %v762_v20 }
 0x277   :  { %v2137_v26 = vand.u32 2147483647, %v2134_v21  ;;  %v886_v16 = vmul.f32 1.442695, %v875_v60  ;;  %vm749_vm1 = vcmp.ge.f32.partialorder %v2134_v21, 0.0 }
 0x278   :  { %v2139_v27 = vpop.eup %1634  ;;  %v809_v28 = vmul.f32 %v2124_v13, %v801_v29  ;;  %v706_v33 = vpop.f32.mrf.mxu0  ;;  %v778_v35 = vadd.f32 1.0, %v770_v25  ;;  %v2145_v42 = vadd.f32 %v685_v39, %v667_v32  ;;  %v874_v29 = vmul.f32 %v866_v1, %v762_v20 }
 0x279   :  { %v792_v34 = vmul.f32 1.0614054, %v2139_v27  ;;  %v773_v38 = vmul.f32 0.3275911, %v2137_v26  ;;  %v707_v45 = vadd.f32 %v706_v33, %v489_v48  ;;  %v725_v50 = vpop.f32.mrf.mxu1 }
 0x27a   :  { %v817_v40 = vadd.f32 1.4214138, %v809_v28  ;;  %1638 = vrcp.f32 %v778_v35  ;;  %v2151_v43 = vmul.f32 0.70710677, %v2145_v42  ;;  %v884_v41 = vmul.f32 1.442695, %v874_v29 }
 0x27b   :  { %v800_v46 = vadd.f32 -1.4531521, %v792_v34  ;;  %v781_v36 = vadd.f32 1.0, %v773_v38  ;;  %v2147_v37 = vpop.eup %1636  ;;  %1640 = vpow2.f32 %v882_v31  ;;  %v2155_v55 = vadd.f32 %v725_v50, %v707_v45 }
 0x27c   :  { %v825_v49 = vmul.f32 %v2124_v13, %v817_v40  ;;  %v795_v54 = vmul.f32 1.0614054, %v2147_v37  ;;  %v2162_v2 = vand.u32 2147483647, %v2151_v43  ;;  %v1946_v50 = vmov -1.0  }
 0x27d   :  { %v808_v53 = vmul.f32 %v2139_v27, %v800_v46  ;;  %1642 = vrcp.f32 %v781_v36  ;;  %v2170_v7 = vmul.f32 0.70710677, %v2155_v55  ;;  %v668_v9 = vpop.f32.mrf.mxu2  ;;  %v731_v29 = vmul.f32 0.5, %v2114_v0 }
 0x27e   :  { %v833_v48 = vadd.f32 -0.28449672, %v825_v49  ;;  %v803_v59 = vadd.f32 -1.4531521, %v795_v54  ;;  %v772_v22 = vmul.f32 0.3275911, %v2162_v2  ;;  %1644 = vpow2.f32 %v880_v58  ;;  %v687_v49 = vpop.f32.mrf.mxu3 }
 0x27f   :  { %v816_v56 = vadd.f32 1.4214138, %v808_v53  ;;  %v669_v32 = vadd.f32 %v668_v9, %v2100_v51  ;;  %v2183_v35 = vand.u32 2147483647, %v2170_v7  ;;  %v753_v53 = vsel %vm745_vm13, 1.0, %v1946_v50 }
 0x280   :  { %v841_v63 = vmul.f32 %v2124_v13, %v833_v48  ;;  %v2164_v3 = vpop.eup %1638  ;;  %v811_v6 = vmul.f32 %v2147_v37, %v803_v59  ;;  %v780_v30 = vadd.f32 1.0, %v772_v22  ;;  %v869_v48 = vsub.f32 0.0, %v2137_v26 }
 0x281   :  { %v824_v5 = vmul.f32 %v2139_v27, %v816_v56  ;;  %v794_v44 = vmul.f32 1.0614054, %v2164_v3  ;;  %v1641_v11 = vpop.eup %1640  ;;  %v775_v36 = vmul.f32 0.3275911, %v2183_v35  ;;  %v2194_v56 = vadd.f32 %v687_v49, %v669_v32 }
 0x282   :  { %v849_v8 = vadd.f32 0.2548296, %v841_v63  ;;  %v819_v23 = vadd.f32 1.4214138, %v811_v6  ;;  %1646 = vrcp.f32 %v780_v30  ;;  %vm751_vm2 = vcmp.ge.f32.partialorder %v2170_v7, 0.0 }
 0x283   :  { %v832_v12 = vadd.f32 -0.28449672, %v824_v5  ;;  %v2174_v17 = vpop.eup %1642  ;;  %v802_v24 = vadd.f32 -1.4531521, %v794_v44  ;;  %1648 = vpow2.f32 %v886_v16  ;;  %v783_v60 = vadd.f32 1.0, %v775_v36 }
 0x284   :  { %v857_v18 = vmul.f32 %v2124_v13, %v849_v8  ;;  %v827_v28 = vmul.f32 %v2147_v37, %v819_v23  ;;  %v797_v31 = vmul.f32 1.0614054, %v2174_v17  ;;  %v1645_v45 = vpop.eup %1644  ;;  %1650 = vpow2.f32 %v884_v41 }
 0x285   :  { %v840_v25 = vmul.f32 %v2139_v27, %v832_v12  ;;  %v810_v34 = vmul.f32 %v2164_v3, %v802_v24  ;;  %1652 = vrcp.f32 %v783_v60  ;;  %v877_v16 = vmul.f32 %v869_v48, %v2137_v26 }
 0x286   :  { %v897_v33 = vmul.f32 %v1641_v11, %v857_v18  ;;  %v835_v13 = vadd.f32 -0.28449672, %v827_v28  ;;  %v805_v39 = vadd.f32 -1.4531521, %v797_v31  ;;  %v2205_v11 = vmul.f32 0.70710677, %v2194_v56 }
 0x287   :  { %v848_v38 = vadd.f32 0.2548296, %v840_v25  ;;  %v818_v40 = vadd.f32 1.4214138, %v810_v34  ;;  %v752_v24 = vsel %vm744_vm14, 1.0, %v1946_v50  ;;  %v755_v26 = vsel %vm747_vm15, 1.0, %v1946_v50 }
 0x288   :  { %v905_v20 = vsub.f32 1.0, %v897_v33  ;;  %v843_v47 = vmul.f32 %v2147_v37, %v835_v13  ;;  %v813_v51 = vmul.f32 %v2174_v17, %v805_v39  ;;  %v2196_v63 = vpop.eup %1646  ;;  %v766_v62 = vand.u32 2147483647, %v2205_v11 }
 0x289   :  { %v856_v46 = vmul.f32 %v2139_v27, %v848_v38  ;;  %v826_v54 = vmul.f32 %v2164_v3, %v818_v40  ;;  %v796_v44 = vmul.f32 1.0614054, %v2196_v63  ;;  %v1649_v22 = vpop.eup %1648  ;;  %v890_v0 = vmul.f32 1.442695, %v877_v16 }
 0x28a   :  { %v851_v27 = vadd.f32 0.2548296, %v843_v47  ;;  %v821_v59 = vadd.f32 1.4214138, %v813_v51  ;;  %v913_v1 = vmul.f32 %v905_v20, %v753_v53  ;;  %v1651_v33 = vpop.eup %1650  ;;  %v868_v40 = vsub.f32 0.0, %v2162_v2 }
 0x28b   :  { %v896_v58 = vmul.f32 %v1645_v45, %v856_v46  ;;  %v834_v5 = vadd.f32 -0.28449672, %v826_v54  ;;  %v804_v18 = vadd.f32 -1.4531521, %v796_v44  ;;  %v2221_v39 = vpop.eup %1652  ;;  %v871_v41 = vsub.f32 0.0, %v2183_v35 }
 0x28c   :  { %v859_v52 = vmul.f32 %v2147_v37, %v851_v27  ;;  %v829_v8 = vmul.f32 %v2174_v17, %v821_v59  ;;  %v728_v37 = vmul.f32 0.5, %v2109_v57  ;;  %v921_v25 = vadd.f32 1.0, %v913_v1 }
 0x28d   :  { %v904_v6 = vsub.f32 1.0, %v896_v58  ;;  %v842_v9 = vmul.f32 %v2164_v3, %v834_v5  ;;  %v812_v32 = vmul.f32 %v2196_v63, %v804_v18  ;;  %v774_v4 = vmul.f32 0.3275911, %v766_v62 }
 0x28e   :  { %v899_v12 = vmul.f32 %v1649_v22, %v859_v52  ;;  %v837_v23 = vadd.f32 -0.28449672, %v829_v8  ;;  %v2226_v45 = vmul.f32 %v921_v25, %v2158_v61  ;;  %v799_v49 = vmul.f32 1.0614054, %v2221_v39 }
 0x28f   :  { %v850_v30 = vadd.f32 0.2548296, %v842_v9  ;;  %v912_v28 = vmul.f32 %v904_v6, %v752_v24  ;;  %v820_v13 = vadd.f32 1.4214138, %v812_v32  ;;  %v782_v53 = vadd.f32 1.0, %v774_v4 }
 0x290   :  { %v907_v31 = vsub.f32 1.0, %v899_v12  ;;  %v845_v57 = vmul.f32 %v2174_v17, %v837_v23  ;;  %v754_v48 = vsel %vm746_vm0, 1.0, %v1946_v50  ;;  %1654 = vpow2.f32 %v890_v0 }
 0x291   :  { %v858_v34 = vmul.f32 %v2164_v3, %v850_v30  ;;  %v920_v3 = vadd.f32 1.0, %v912_v28  ;;  %v828_v47 = vmul.f32 %v2196_v63, %v820_v13  ;;  %v876_v61 = vmul.f32 %v868_v40, %v2162_v2 }
 0x292   :  { %v915_v38 = vmul.f32 %v907_v31, %v755_v26  ;;  %v853_v36 = vadd.f32 0.2548296, %v845_v57  ;;  %v807_v59 = vadd.f32 -1.4531521, %v799_v49  ;;  %1656 = vrcp.f32 %v782_v53 }
 0x293   :  { %v898_v20 = vmul.f32 %v1651_v33, %v858_v34  ;;  %v836_v58 = vadd.f32 -0.28449672, %v828_v47  ;;  %v937_v60 = vmul.f32 %v2226_v45, %v2226_v45  ;;  %v730_v5 = vmul.f32 0.5, %v2122_v10 }
 0x294   :  { %v923_v46 = vadd.f32 1.0, %v915_v38  ;;  %v879_v6 = vmul.f32 %v871_v41, %v2183_v35  ;;  %v2242_v52 = vmul.f32 %v920_v3, %v728_v37  ;;  %v861_v8 = vmul.f32 %v2174_v17, %v853_v36 }
 0x295   :  { %v906_v51 = vsub.f32 1.0, %v898_v20  ;;  %v815_v44 = vmul.f32 %v2221_v39, %v807_v59  ;;  %v844_v22 = vmul.f32 %v2196_v63, %v836_v58  ;;  %v888_v12 = vmul.f32 1.442695, %v876_v61 }
 0x296   :  { %v2230_v54 = vmul.f32 %v923_v46, %v731_v29  ;;  %v1655_v16 = vpop.eup %1654  ;;  %v894_v24 = vmul.f32 1.442695, %v879_v6  ;;  %v870_v10 = vsub.f32 0.0, %v766_v62  ;;  %v936_v35 = vmul.f32 %v2242_v52, %v2242_v52 }
 0x297   :  { %v914_v27 = vmul.f32 %v906_v51, %v754_v48  ;;  %v823_v23 = vadd.f32 1.4214138, %v815_v44  ;;  %v901_v37 = vmul.f32 %v1655_v16, %v861_v8  ;;  %v852_v28 = vadd.f32 0.2548296, %v844_v22 }
 0x298   :  { %v939_v1 = vmul.f32 %v2230_v54, %v2230_v54  ;;  %v1657_v29 = vpop.eup %1656  ;;  %1658 = vpow2.f32 %v888_v12  ;;  %v878_v13 = vmul.f32 %v870_v10, %v766_v62  ;;  %v757_v47 = vsel %vm749_vm1, 1.0, %v1946_v50 }
 0x299   :  { %v922_v14 = vadd.f32 1.0, %v914_v27  ;;  %v831_v30 = vmul.f32 %v2221_v39, %v823_v23  ;;  %v798_v31 = vmul.f32 1.0614054, %v1657_v29  ;;  %1660 = vpow2.f32 %v894_v24 }
 0x29a   :  { %v951_v2 = vadd.f32 %v939_v1, %v937_v60  ;;  %v909_v38 = vsub.f32 1.0, %v901_v37  ;;  %v860_v40 = vmul.f32 %v2196_v63, %v852_v28  ;;  %v892_v48 = vmul.f32 1.442695, %v878_v13 }
 0x29b   :  { %v2247_v9 = vmul.f32 %v922_v14, %v730_v5  ;;  %v839_v33 = vadd.f32 -0.28449672, %v831_v30  ;;  %v806_v34 = vadd.f32 -1.4531521, %v798_v31  ;;  %vm748_vm3 = vcmp.ge.f32.partialorder %v2151_v43, 0.0 }
 0x29c   :  { %v952_v18 = vrot.slane %v951_v2, 4  ;;  %v917_v21 = vmul.f32 %v909_v38, %v757_v47  ;;  %v759_v14 = vsel %vm751_vm2, 1.0, %v1946_v50  ;;  %v756_v7 = vsel %vm748_vm3, 1.0, %v1946_v50 }
 0x29d   :  { %v938_v17 = vmul.f32 %v2247_v9, %v2247_v9  ;;  %v847_v0 = vmul.f32 %v2221_v39, %v839_v33  ;;  %v814_v41 = vmul.f32 %v1657_v29, %v806_v34  ;;  %v735_v43 = vmul.f32 0.5, %v2155_v55 }
 0x29e   :  { %v953_v25 = vadd.f32 %v952_v18, %v951_v2  ;;  %v1659_v36 = vpop.eup %1658  ;;  %v925_v5 = vadd.f32 1.0, %v917_v21  ;;  %v733_v2 = vmul.f32 0.5, %v2129_v15  ;;  %vm750_vm4 = vcmp.ge.f32.partialorder %v2205_v11, 0.0 }
 0x29f   :  { %v944_v32 = vadd.f32 %v938_v17, %v936_v35  ;;  %v855_v3 = vadd.f32 0.2548296, %v847_v0  ;;  %v822_v51 = vadd.f32 1.4214138, %v814_v41  ;;  %v1661_v58 = vpop.eup %1660  ;;  %v900_v62 = vmul.f32 %v1659_v36, %v860_v40 }
 0x2a0   :  { %v954_v26 = vrot.slane %v953_v25, 2  ;;  %v2267_v23 = vmul.f32 %v925_v5, %v733_v2  ;;  %v732_v34 = vmul.f32 0.5, %v2145_v42 }
 0x2a1   :  { %v945_v57 = vrot.slane %v944_v32, 4  ;;  %v863_v53 = vmul.f32 %v2221_v39, %v855_v3  ;;  %v830_v61 = vmul.f32 %v1657_v29, %v822_v51  ;;  %v908_v39 = vsub.f32 1.0, %v900_v62 }
 0x2a2   :  { %v955_v20 = vadd.f32 %v954_v26, %v953_v25  ;;  %v941_v30 = vmul.f32 %v2267_v23, %v2267_v23 }
 0x2a3   :  { %v946_v4 = vadd.f32 %v945_v57, %v944_v32  ;;  %v903_v63 = vmul.f32 %v1661_v58, %v863_v53  ;;  %v838_v60 = vadd.f32 -0.28449672, %v830_v61  ;;  %v916_v24 = vmul.f32 %v908_v39, %v756_v7  ;;  %v1595_v7 = vld [vmem:[#allocation14 + $0x30] sm:$0xff] }
 0x2a4   :  { %v956_v46 = vrot.slane %v955_v20, 1 }
 0x2a5   :  { %v947_v49 = vrot.slane %v946_v4, 2  ;;  %v911_v6 = vsub.f32 1.0, %v903_v63  ;;  %v846_v8 = vmul.f32 %v1657_v29, %v838_v60  ;;  %v924_v28 = vadd.f32 1.0, %v916_v24 }
 0x2a6   :  { %v2259_v27 = vadd.f32 %v956_v46, %v955_v20  ;;  %v734_v20 = vmul.f32 0.5, %v2194_v56 }
 0x2a7   :  { %v948_v59 = vadd.f32 %v947_v49, %v946_v4  ;;  %v919_v22 = vmul.f32 %v911_v6, %v759_v14  ;;  %v854_v12 = vadd.f32 0.2548296, %v846_v8  ;;  %v2280_v13 = vmul.f32 %v924_v28, %v732_v34  ;;  %v1596_v14 = vld [vmem:[#allocation14 + $0x38] sm:$0xff] }
 0x2a8   :  { %1662 = vrsqrt.f32 %v2259_v27  ;;  %vm991_vm5 = vcmp.eq.f32.partialorder %v2259_v27, inf  ;;  %v994_v60 = vand.u32 2147483648, %v2259_v27  ;;  %vm993_vm8 = vcmp.eq.f32.partialorder %v2259_v27, 0.0  ;;  %v1604_v8 = vld [vmem:[#allocation14 + $0x78] sm:$0xff]  ;;  %1216 = vmatpush.bf16.msrb.mxu2 %v1596_v14 }
 0x2a9   :  { %v949_v1 = vrot.slane %v948_v59, 1  ;;  %1664 = vpow2.f32 %v892_v48  ;;  %v927_v16 = vadd.f32 1.0, %v919_v22  ;;  %v862_v10 = vmul.f32 %v1657_v29, %v854_v12  ;;  %1235 = vmatpush.bf16.msrb.mxu3 %v1604_v8  ;;  %v1603_v12 = vld [vmem:[#allocation14 + $0x70] sm:$0xff] }
 0x2aa   :  { %v758_v29 = vsel %vm750_vm4, 1.0, %v1946_v50  ;;  %v940_v50 = vmul.f32 %v2280_v13, %v2280_v13 }
 0x2ab   :  { %v950_v44 = vadd.f32 %v949_v1, %v948_v59  ;;  %v2270_v17 = vmul.f32 %v927_v16, %v735_v43 }
 0x2ac   :  { %1217 = vmatpush.bf16.msrb.mxu2 %v1595_v7 }
 0x2ad   :  { %1666 = vrsqrt.f32 %v950_v44  ;;  %v943_v25 = vmul.f32 %v2270_v17, %v2270_v17  ;;  %vm979_vm6 = vcmp.eq.f32.partialorder %v950_v44, inf  ;;  %v982_v63 = vand.u32 2147483648, %v950_v44  ;;  %1236 = vmatpush.bf16.msrb.mxu3 %v1603_v12 }
 0x2ae   :  { %v1663_v18 = vpop.eup %1662  ;;  %vm981_vm7 = vcmp.eq.f32.partialorder %v950_v44, 0.0 }
 0x2af   :  { %v1665_v35 = vpop.eup %1664  ;;  %v985_v37 = vmul.f32 %v1663_v18, %v2259_v27  ;;  %v965_v33 = vadd.f32 %v943_v25, %v941_v30 }
 0x2b0   :  { %v902_v15 = vmul.f32 %v1665_v35, %v862_v10 }
 0x2b1   :  { %v986_v55 = vmul.f32 %v1663_v18, %v985_v37  ;;  %v966_v11 = vrot.slane %v965_v33, 4 }
 0x2b2   :  { %v910_v31 = vsub.f32 1.0, %v902_v15 }
 0x2b3   :  { %v1667_v32 = vpop.eup %1666  ;;  %v987_v26 = vmul.f32 0.5, %v986_v55  ;;  %v967_v4 = vadd.f32 %v966_v11, %v965_v33 }
 0x2b4   :  { %v918_v57 = vmul.f32 %v910_v31, %v758_v29  ;;  %v973_v38 = vmul.f32 %v1667_v32, %v950_v44 }
 0x2b5   :  { %v988_v0 = vsub.f32 1.5, %v987_v26  ;;  %v968_v51 = vrot.slane %v967_v4, 2 }
 0x2b6   :  { %v926_v40 = vadd.f32 1.0, %v918_v57  ;;  %v974_v41 = vmul.f32 %v1667_v32, %v973_v38 }
 0x2b7   :  { %v989_v3 = vmul.f32 %v1663_v18, %v988_v0  ;;  %v969_v21 = vadd.f32 %v968_v51, %v967_v4  ;;  %v1601_v4 = vld [vmem:[#allocation14 + $0x60] sm:$0xff]  ;;  %v1591_v51 = vld [vmem:[#allocation14 + $0x10] sm:$0xff] }
 0x2b8   :  { %v2283_v46 = vmul.f32 %v926_v40, %v734_v20  ;;  %v975_v47 = vmul.f32 0.5, %v974_v41  ;;  %v1602_v40 = vld [vmem:[#allocation14 + $0x68] sm:$0xff]  ;;  %v1593_v41 = vld [vmem:[#allocation14 + $0x20] sm:$0xff] }
 0x2b9   :  { %v990_v49 = vmul.f32 %v989_v3, %v2259_v27  ;;  %v970_v48 = vrot.slane %v969_v21, 1  ;;  %1237 = vmatpush.bf16.msrb.mxu3 %v1602_v40  ;;  %v1592_v3 = vld [vmem:[#allocation14 + $0x18] sm:$0xff] }
 0x2ba   :  { %v942_v42 = vmul.f32 %v2283_v46, %v2283_v46  ;;  %v976_v36 = vsub.f32 1.5, %v975_v47  ;;  %v1600_v47 = vld [vmem:[#allocation14 + $0x58] sm:$0xff] }
 0x2bb   :  { %v992_v61 = vsel %vm991_vm5, %v2259_v27, %v990_v49  ;;  %v971_v59 = vadd.f32 %v970_v48, %v969_v21  ;;  %v1594_v27 = vld [vmem:[#allocation14 + $0x28] sm:$0xff]  ;;  %v1589_v21 = vld [vmem:[#allocation14] sm:$0xff] }
 0x2bc   :  { %v958_v53 = vadd.f32 %v942_v42, %v940_v50  ;;  %v977_v56 = vmul.f32 %v1667_v32, %v976_v36  ;;  %v2296_v39 = vsel %vm993_vm8, %v994_v60, %v992_v61  ;;  %1218 = vmatpush.bf16.msrb.mxu2 %v1594_v27  ;;  %v1599_v50 = vld [vmem:[#allocation14 + $0x50] sm:$0xff]  ;;  %v1590_v42 = vld [vmem:[#allocation14 + $0x8] sm:$0xff] }
 0x2bd   :  { %1668 = vrsqrt.f32 %v971_v59  ;;  %vm1015_vm9 = vcmp.eq.f32.partialorder %v971_v59, inf  ;;  %v1018_v57 = vand.u32 2147483648, %v971_v59  ;;  %vm1017_vm12 = vcmp.eq.f32.partialorder %v971_v59, 0.0  ;;  %1238 = vmatpush.bf16.msrb.mxu3 %v1601_v4  ;;  %v1598_v36 = vld [vmem:[#allocation14 + $0x48] sm:$0xff] }
 0x2be   :  { %v959_v58 = vrot.slane %v958_v53, 4  ;;  %v978_v62 = vmul.f32 %v977_v56, %v950_v44 }
 0x2c0   :  { %v960_v1 = vadd.f32 %v959_v58, %v958_v53  ;;  %v980_v5 = vsel %vm979_vm6, %v950_v44, %v978_v62  ;;  %1219 = vmatpush.bf16.msrb.mxu2 %v1593_v41  ;;  %v1597_v53 = vld [vmem:[#allocation14 + $0x40] sm:$0xff]  ;;  %v1036_v58 = vld [vmem:[#allocation11] sm:$0x3]  ;;  %v1037_v62 = vld [vmem:[#allocation13] sm:$0x3] }
 0x2c1   :  { %v2294_v6 = vsel %vm981_vm7, %v982_v63, %v980_v5  ;;  %1239 = vmatpush.bf16.msrb.mxu3 %v1600_v47  ;;  %v1047_v60 = vperm.slane %v1036_v58, 0  ;;  %v1060_v5 = vperm.slane %v1037_v62, 0  ;;  %v1061_v14 = vperm.slane %v1037_v62, 1 }
 0x2c2   :  { %v961_v2 = vrot.slane %v960_v1, 2  ;;  %v1020_v22 = vadd.f32 %v2296_v39, %v2294_v6 }
 0x2c3   :  { %v1669_v16 = vpop.eup %1668 }
 0x2c4   :  { %v962_v43 = vadd.f32 %v961_v2, %v960_v1  ;;  %1021 = vadd.xlane.f32.xlu2 %v1020_v22  ;;  %v1009_v24 = vmul.f32 %v1669_v16, %v971_v59  ;;  %1220 = vmatpush.bf16.msrb.mxu2 %v1592_v3  ;;  %v1048_v1 = vperm.slane %v1036_v58, 1  ;;  %v1677_v58 = vld [vmem:[#allocation2 + $0x8] sm:$0xff] }
 0x2c5   :  { %1240 = vmatpush.bf16.msrb.mxu3 %v1599_v50 }
 0x2c6   :  { %v963_v44 = vrot.slane %v962_v43, 1  ;;  %v1010_v10 = vmul.f32 %v1669_v16, %v1009_v24 }
 0x2c8   :  { %v964_v18 = vadd.f32 %v963_v44, %v962_v43  ;;  %v1011_v35 = vmul.f32 0.5, %v1010_v10  ;;  %1221 = vmatpush.bf16.msrb.mxu2 %v1591_v51  ;;  %v1621_v51 = vld [vmem:[#allocation16] ss:$0 sm:$0xff] }
 0x2c9   :  { %1241 = vmatpush.bf16.msrb.mxu3 %v1598_v36 }
 0x2ca   :  { %1670 = vrsqrt.f32 %v964_v18  ;;  %v1012_v37 = vsub.f32 1.5, %v1011_v35  ;;  %vm1003_vm10 = vcmp.eq.f32.partialorder %v964_v18, inf  ;;  %v1006_v34 = vand.u32 2147483648, %v964_v18 }
 0x2cb   :  { %vm1005_vm11 = vcmp.eq.f32.partialorder %v964_v18, 0.0 }
 0x2cc   :  { %v1013_v55 = vmul.f32 %v1669_v16, %v1012_v37  ;;  %1222 = vmatpush.bf16.msrb.mxu2 %v1590_v42 }
 0x2cd   :  { %1242 = vmatpush.bf16.msrb.mxu3 %v1597_v53 }
 0x2ce   :  { %v1014_v32 = vmul.f32 %v1013_v55, %v971_v59 }
 0x2d0   :  { %v1671_v15 = vpop.eup %1670  ;;  %v1016_v26 = vsel %vm1015_vm9, %v971_v59, %v1014_v32  ;;  %1223 = vmatpush.bf16.msrb.mxu2 %v1589_v21  ;;  %v1676_v21 = vld [vmem:[#allocation2] sm:$0xff] }
 0x2d1   :  { %v997_v30 = vmul.f32 %v1671_v15, %v964_v18  ;;  %v2302_v0 = vsel %vm1017_vm12, %v1018_v57, %v1016_v26 }
 0x2d3   :  { %v998_v25 = vmul.f32 %v1671_v15, %v997_v30 }
 0x2d5   :  { %v999_v28 = vmul.f32 0.5, %v998_v25 }
 0x2d7   :  { %v1000_v31 = vsub.f32 1.5, %v999_v28 }
 0x2d9   :  { %v1001_v33 = vmul.f32 %v1671_v15, %v1000_v31 }
 0x2db   :  { %v1002_v29 = vmul.f32 %v1001_v33, %v964_v18 }
 0x2dd   :  { %v1004_v38 = vsel %vm1003_vm10, %v964_v18, %v1002_v29 }
 0x2de   :  { %v2300_v11 = vsel %vm1005_vm11, %v1006_v34, %v1004_v38 }
 0x2df   :  { %v1023_v20 = vadd.f32 %v2302_v0, %v2300_v11 }
 0x2e1   :  { %1024 = vadd.xlane.f32.xlu0 %v1023_v20 }
 0x337   :  { %v1022_v49 = vpop.xlane.xlu2 %1021 }
 0x338   :  { %v1026_v56 = vmul.f32 %v1022_v49, %v2044_v19 }
 0x33a   :  { %v1028_v48 = vadd.f32 1e-06, %v1026_v56 }
 0x33c   :  { %1672 = vrcp.f32 %v1028_v48 }
 0x342   :  { %v1673_v61 = vpop.eup %1672 }
 0x343   :  { %v1032_v59 = vmul.f32 %v1673_v61, %v2294_v6  ;;  %v1033_v63 = vmul.f32 %v1673_v61, %v2296_v39 }
 0x345   :  { %v1038_v8 = vmul.f32 %v1032_v59, %v2242_v52  ;;  %v1039_v2 = vmul.f32 %v1033_v63, %v2226_v45  ;;  %v1040_v22 = vmul.f32 %v1032_v59, %v2247_v9  ;;  %v1041_v7 = vmul.f32 %v1033_v63, %v2230_v54  ;;  %v1678_v63 = vld [vmem:[#allocation2 + $0x10] sm:$0xff] }
 0x347   :  { %v1051_v12 = vmul.f32 %v1047_v60, %v1038_v8  ;;  %v1053_v43 = vmul.f32 %v1047_v60, %v1040_v22  ;;  %v1052_v44 = vmul.f32 %v1048_v1, %v1039_v2  ;;  %v1054_v16 = vmul.f32 %v1048_v1, %v1041_v7  ;;  %v1679_v2 = vld [vmem:[#allocation2 + $0x18] sm:$0xff] }
 0x349   :  { %v1064_v27 = vadd.f32 %v1060_v5, %v1051_v12  ;;  %v1066_v6 = vadd.f32 %v1060_v5, %v1053_v43  ;;  %v1065_v18 = vadd.f32 %v1061_v14, %v1052_v44  ;;  %v1067_v39 = vadd.f32 %v1061_v14, %v1054_v16 }
 0x34b   :  { %v1072_v24 = vadd.f32 %v1064_v27, %v2242_v52  ;;  %v1074_v10 = vadd.f32 %v1066_v6, %v2247_v9  ;;  %v1073_v35 = vadd.f32 %v1065_v18, %v2226_v45  ;;  %v1075_v37 = vadd.f32 %v1067_v39, %v2230_v54 }
 0x34d   :  { %v1080_v15 = vpack.c.bf16 %v1074_v10, %v1072_v24  ;;  %v1081_v30 = vpack.c.bf16 %v1075_v37, %v1073_v35 }
 0x34f   :  { %1224 = vmatmul.bf16.vlgmr.msrb.gmra.mxu2 %v1080_v15  ;;  %1243 = vmatmul.bf16.vlgmr.msrb.gmra.mxu3 %v1081_v30 }
 0x354   :  { %v1025_v25 = vpop.xlane.xlu0 %1024 }
 0x355   :  { %v1027_v55 = vmul.f32 %v1025_v25, %v2044_v19 }
 0x357   :  { %v1029_v28 = vadd.f32 1e-06, %v1027_v55 }
 0x359   :  { %1674 = vrcp.f32 %v1029_v28 }
 0x35f   :  { %v1675_v31 = vpop.eup %1674 }
 0x360   :  { %v1034_v32 = vmul.f32 %v1675_v31, %v2300_v11  ;;  %v1035_v52 = vmul.f32 %v1675_v31, %v2302_v0 }
 0x362   :  { %v1042_v9 = vmul.f32 %v1034_v32, %v2280_v13  ;;  %v1044_v45 = vmul.f32 %v1034_v32, %v2283_v46  ;;  %v1043_v54 = vmul.f32 %v1035_v52, %v2267_v23  ;;  %v1045_v33 = vmul.f32 %v1035_v52, %v2270_v17 }
 0x364   :  { %v1055_v29 = vmul.f32 %v1047_v60, %v1042_v9  ;;  %v1057_v26 = vmul.f32 %v1047_v60, %v1044_v45  ;;  %v1056_v34 = vmul.f32 %v1048_v1, %v1043_v54  ;;  %v1058_v57 = vmul.f32 %v1048_v1, %v1045_v33 }
 0x366   :  { %v1068_v19 = vadd.f32 %v1060_v5, %v1055_v29  ;;  %v1070_v38 = vadd.f32 %v1060_v5, %v1057_v26  ;;  %v1069_v20 = vadd.f32 %v1061_v14, %v1056_v34  ;;  %v1071_v40 = vadd.f32 %v1061_v14, %v1058_v57 }
 0x368   :  { %v1076_v11 = vadd.f32 %v1068_v19, %v2280_v13  ;;  %v1078_v0 = vadd.f32 %v1070_v38, %v2283_v46  ;;  %v1077_v41 = vadd.f32 %v1069_v20, %v2267_v23  ;;  %v1079_v4 = vadd.f32 %v1071_v40, %v2270_v17 }
 0x36a   :  { %v1082_v3 = vpack.c.bf16 %v1078_v0, %v1076_v11  ;;  %v1083_v47 = vpack.c.bf16 %v1079_v4, %v1077_v41 }
 0x36c   :  { %1229 = vmatmul.bf16.gmra.mxu2 %v1082_v3  ;;  %1248 = vmatmul.bf16.gmra.mxu3 %v1083_v47 }
 0x3d2   :  { %v1225_v50 = vpop.f32.mrf.mxu2  ;;  %v1244_v42 = vpop.f32.mrf.mxu3 }
 0x3d3   :  { %v1226_v36 = vadd.f32 %v1621_v51, %v1225_v50 }
 0x3d5   :  { %v1245_v49 = vadd.f32 %v1244_v42, %v1226_v36 }
 0x3d7   :  { %v1254_v53 = vadd.f32 %v1676_v21, %v1245_v49 }
 0x3d9   :  { %1258 = vst [vmem:[#allocation17] sm:$0xff] %v1254_v53 }
 0x3da   :  { %v1227_v56 = vpop.f32.mrf.mxu2  ;;  %v1246_v48 = vpop.f32.mrf.mxu3 }
 0x3db   :  { %v1228_v13 = vadd.f32 %v1621_v51, %v1227_v56 }
 0x3dd   :  { %v1247_v46 = vadd.f32 %v1246_v48, %v1228_v13 }
 0x3df   :  { %v1255_v23 = vadd.f32 %v1677_v58, %v1247_v46 }
 0x3e1   :  { %1259 = vst [vmem:[#allocation17 + $0x8] sm:$0xff] %v1255_v23 }
 0x3ef   :  { %v1230_v17 = vpop.f32.mrf.mxu2  ;;  %v1249_v62 = vpop.f32.mrf.mxu3 }
 0x3f0   :  { %v1231_v61 = vadd.f32 %v1621_v51, %v1230_v17 }
 0x3f2   :  { %v1250_v59 = vadd.f32 %v1249_v62, %v1231_v61 }
 0x3f4   :  { %v1256_v60 = vadd.f32 %v1678_v63, %v1250_v59 }
 0x3f6   :  { %1260 = vst [vmem:[#allocation17 + $0x10] sm:$0xff] %v1256_v60 }
 0x3f7   :  { %v1232_v1 = vpop.f32.mrf.mxu2  ;;  %v1251_v14 = vpop.f32.mrf.mxu3 }
 0x3f8   :  { %v1233_v5 = vadd.f32 %v1621_v51, %v1232_v1 }
 0x3fa   :  { %v1252_v8 = vadd.f32 %v1251_v14, %v1233_v5 }
 0x3fc   :  { %v1257_v22 = vadd.f32 %v1679_v2, %v1252_v8 }
 0x3fe   :  { %1261 = vst [vmem:[#allocation17 + $0x18] sm:$0xff] %v1257_v22 }
 0x3ff   :  { %1274 = dma.vmem_to_hbm [thread:$0]  %s1267_s4, 512, %s1269_s9, [#allocation4], %s1933_s25, %s1933_s25, %s1934_s26  }
 0x400   :  { %1930 = dma.done.wait [#allocation4], 512  }
 0x401   :  { %1931 = vsyncadd [#allocation4], 4294966784 }
 0x402   :  { %1279 = vsyncpa [#allocation3], 1 }
 0x403   :  { %1280 = vsyncpa [#allocation6], 1 }
 0x404   :  { %1281 = vsyncpa [#allocation9], 1 }
 0x405   :  { %1282 = vsyncpa [#allocation12], 1 }
 0x406   :  { %1283 = vsyncpa [#allocation15], 1 }
 0x407   :  { %1284 = vsyncpa [#allocation4], 1 }

</bundles_post_ra>
